<compile_context>
chip_gen: v6e
topology: v6e:2x2x1
jax: 0.10.0
libtpu: 0.0.40
codegen_flags: <defaults>
</compile_context>

<pallas_src>
import jax
import jax.numpy as jnp
from jax import lax
from jax.experimental import pallas as pl
from jax.experimental.pallas import tpu as pltpu


def _round_up(x, m):
    return ((x + m - 1) // m) * m


def lstm_classifier_kernel(tok_ref, qlen_ref, gt_ref, whh_ref,
                           w1_ref, b1_ref, w2_ref, b2_ref,
                           out_ref, gx_scr):
    """Fused embedding/gate gather + serial LSTM recurrence + MLP classifier.

    tok_ref  : (B, T)    i32 SMEM  question tokens (<NULL>-padded)
    qlen_ref : (B, 1)    i32 VMEM  valid lengths (pre-clamped to [1, T])
    gt_ref   : (N, 4H)   f32 VMEM  gate table: E @ W_ih + (b_ih + b_hh)
    whh_ref  : (H, 4H)   f32 VMEM  hidden->gates weight (pre-transposed)
    w1_ref   : (H, 256)  f32 VMEM
    b1_ref   : (1, 256)  f32 VMEM
    w2_ref   : (256, Cp) f32 VMEM  lane-padded to Cp (multiple of 128)
    b2_ref   : (1, Cp)   f32 VMEM
    out_ref  : (B, Cp)   f32 VMEM  lane-dense logits (caller slices [:, :C])
    gx_scr   : (B, 4H)   f32 VMEM  scratch for the per-step gathered gate rows
    """
    B, T = tok_ref.shape
    H = whh_ref.shape[0]

    # Loop-invariant: last valid step index per example.
    qlen_m1 = qlen_ref[...] - 1                                 # (B, 1) i32

    h0 = jnp.zeros((B, H), jnp.float32)
    c0 = jnp.zeros((B, H), jnp.float32)
    hl0 = jnp.zeros((B, H), jnp.float32)

    def step(t, carry):
        h, c, hlast = carry

        # In-kernel embedding + input-projection lookup: B dynamic row slices
        # of the tiny VMEM-resident gate table; token scalars come from SMEM.
        # (Gathers have no data dependence on the carry, so the scheduler can
        # overlap them with the previous step's recurrent matmul.)
        for b in range(B):
            gx_scr[pl.ds(b, 1), :] = gt_ref[pl.ds(tok_ref[b, t], 1), :]

        # Only the tiny recurrent matmul sits on the serial path; kept in f32
        # (K = H) for parity with the f32 PyTorch reference.
        gates = gx_scr[...] + jnp.dot(h, whh_ref[...],
                                      preferred_element_type=jnp.float32)

        # Two full-vreg EUP activations over the whole (B, 4H) gate tile.
        sig = jax.nn.sigmoid(gates)
        th = jnp.tanh(gates)
        # PyTorch LSTM gate order: i, f, g, o (static lane slices).
        i_g = sig[:, 0 * H:1 * H]
        f_g = sig[:, 1 * H:2 * H]
        g_g = th[:, 2 * H:3 * H]
        o_g = sig[:, 3 * H:4 * H]

        c_new = f_g * c + i_g * g_g
        h_new = o_g * jnp.tanh(c_new)
        # Capture hidden state at the last valid step of each sequence.
        hlast = jnp.where(qlen_m1 == t, h_new, hlast)
        return h_new, c_new, hlast

    _, _, hlast = lax.fori_loop(0, T, step, (h0, c0, hl0), unroll=True)

    # AnswerModule MLP: Linear -> ReLU -> Linear (dropout inactive at eval).
    hid = jnp.dot(hlast, w1_ref[...],
                  preferred_element_type=jnp.float32) + b1_ref[...]
    hid = jnp.maximum(hid, 0.0)
    # Lane-dense (Cp = multiple of 128) unmasked store.
    out_ref[...] = jnp.dot(hid, w2_ref[...],
                           preferred_element_type=jnp.float32) + b2_ref[...]


def prepare_params(params):
    """One-time inference-time param prep (outside the hot forward path).

    * Folds the LSTM input projection + combined bias into the embedding:
        gate_table[n] = E[n] @ W_ih + (b_ih + b_hh)
      (zero <NULL> row -> bias-only gates, matching x_t = 0).
    * Lane-pads the classifier output to a multiple of 128 columns so the
      kernel's final store is lane-dense (no masked partial stores).
    """
    gate_table = (params["embedding"].astype(jnp.float32)
                  @ params["w_ih"].astype(jnp.float32)
                  + params["b_gates"].astype(jnp.float32))        # (N, 4H)
    C = params["w2"].shape[1]
    Cp = _round_up(C, 128)
    w2p = jnp.zeros((params["w2"].shape[0], Cp), jnp.float32)
    w2p = w2p.at[:, :C].set(params["w2"].astype(jnp.float32))
    b2p = jnp.zeros((1, Cp), jnp.float32)
    b2p = b2p.at[:, :C].set(params["b2"].astype(jnp.float32))
    return {
        "gate_table": gate_table,                  # (N, 4H) f32
        "w_hh": params["w_hh"].astype(jnp.float32),
        "w1": params["w1"].astype(jnp.float32),
        "b1": params["b1"].astype(jnp.float32),
        "w2": w2p,                                 # (256, Cp) f32
        "b2": b2p,                                 # (1, Cp)  f32
        "num_classes": C,
    }


def lstm_basic_forward(tokens, q_len, prep):
    """tokens: (B, T) int32, q_len: (B,) int32 -> logits (B, C)."""
    B, T = tokens.shape
    C = prep["num_classes"]
    Cp = prep["w2"].shape[1]
    H = prep["w_hh"].shape[0]

    # Pad batch to a full f32 sublane multiple (>= 8).  Padded rows use the
    # <NULL> token and q_len = 1; their outputs are sliced off below.
    Bp = max(8, _round_up(B, 8))
    tokens_p = jnp.zeros((Bp, T), jnp.int32).at[:B, :].set(
        tokens.astype(jnp.int32))
    qlen_c = jnp.clip(q_len.astype(jnp.int32), 1, T)   # guard hlast capture
    qlen_p = jnp.ones((Bp, 1), jnp.int32).at[:B, 0].set(qlen_c)

    vmem = pl.BlockSpec(memory_space=pltpu.MemorySpace.VMEM)
    smem = pl.BlockSpec(memory_space=pltpu.MemorySpace.SMEM)

    # TODO(synk): at production batch sizes add a leading "parallel" batch
    # grid axis (<=128-row tiles on v5e, <=256 on v6e/v7x) so the recurrence
    # shards across v7x's two TensorCores.
    out = pl.pallas_call(
        lstm_classifier_kernel,
        out_shape=jax.ShapeDtypeStruct((Bp, Cp), jnp.float32),
        in_specs=[smem, vmem, vmem, vmem, vmem, vmem, vmem, vmem],
        out_specs=vmem,
        scratch_shapes=[pltpu.VMEM((Bp, 4 * H), jnp.float32)],
    )(
        tokens_p,                  # (Bp, T)   i32  SMEM
        qlen_p,                    # (Bp, 1)   i32
        prep["gate_table"],        # (N, 4H)   f32
        prep["w_hh"],              # (H, 4H)   f32
        prep["w1"],                # (H, 256)  f32
        prep["b1"],                # (1, 256)  f32
        prep["w2"],                # (256, Cp) f32
        prep["b2"],                # (1, Cp)   f32
    )
    return out[:B, :C]


def reference_forward(tokens, q_len, params):
    """Pure-JAX reference of the same forward (embedding -> LSTM -> MLP)."""
    emb = params["embedding"][tokens]                           # (B, T, D)
    gx = jnp.einsum("btd,dg->btg", emb, params["w_ih"]) + params["b_gates"]
    B, T, _ = gx.shape
    H = params["w_hh"].shape[0]
    h = jnp.zeros((B, H), jnp.float32)
    c = jnp.zeros((B, H), jnp.float32)
    hlast = jnp.zeros((B, H), jnp.float32)
    for t in range(T):
        gates = gx[:, t] + h @ params["w_hh"]
        i_g = jax.nn.sigmoid(gates[:, 0 * H:1 * H])
        f_g = jax.nn.sigmoid(gates[:, 1 * H:2 * H])
        g_g = jnp.tanh(gates[:, 2 * H:3 * H])
        o_g = jax.nn.sigmoid(gates[:, 3 * H:4 * H])
        c = f_g * c + i_g * g_g
        h = o_g * jnp.tanh(c)
        hlast = jnp.where((q_len - 1)[:, None] == t, h, hlast)
    hid = jnp.maximum(hlast @ params["w1"] + params["b1"], 0.0)
    return hid @ params["w2"] + params["b2"]


def init_params(key, vocab_size, embed_dim, hidden, mlp_hidden, num_classes,
                padding_idx):
    ks = jax.random.split(key, 8)
    scale = 0.05
    emb = scale * jax.random.normal(ks[0], (vocab_size, embed_dim), jnp.float32)
    emb = emb.at[padding_idx].set(0.0)              # padding_idx row is zero
    params = {
        "embedding": emb,
        # Stored pre-transposed as (in, out) = (D, 4H) / (H, 4H).
        "w_ih": scale * jax.random.normal(ks[1], (embed_dim, 4 * hidden), jnp.float32),
        "w_hh": scale * jax.random.normal(ks[2], (hidden, 4 * hidden), jnp.float32),
        "b_gates": scale * jax.random.normal(ks[3], (1, 4 * hidden), jnp.float32),
        "w1": scale * jax.random.normal(ks[4], (hidden, mlp_hidden), jnp.float32),
        "b1": scale * jax.random.normal(ks[5], (1, mlp_hidden), jnp.float32),
        "w2": scale * jax.random.normal(ks[6], (mlp_hidden, num_classes), jnp.float32),
        "b2": scale * jax.random.normal(ks[7], (1, num_classes), jnp.float32),
    }
    return params


if __name__ == "__main__":
    # Small shapes consistent with the module's forward.
    B, T = 2, 8                 # batch, question length
    VOCAB = 64                  # len(vocab['question_token_to_idx'])
    D = 200                     # embedding dim (fixed in module)
    H = 32                      # ques_feat_size
    MLP_HIDDEN = 256            # AnswerModule hidden (256,)
    NUM_CLASSES = 16
    PADDING_IDX = 0             # '<NULL>'

    key = jax.random.PRNGKey(0)
    k_param, k_tok, k_len = jax.random.split(key, 3)

    params = init_params(k_param, VOCAB, D, H, MLP_HIDDEN, NUM_CLASSES,
                         PADDING_IDX)
    prep = prepare_params(params)   # one-time fold of W_ih/bias into the table

    tokens = jax.random.randint(k_tok, (B, T), 1, VOCAB, dtype=jnp.int32)
    q_len = jnp.array([T, T - 3], dtype=jnp.int32)   # valid lengths (>= 1)
    # Zero-pad (<NULL>) positions past q_len, mirroring the data pipeline.
    pos = jnp.arange(T, dtype=jnp.int32)[None, :]
    tokens = jnp.where(pos < q_len[:, None], tokens, PADDING_IDX)

    # feat / point_set are deleted in forward -> not modeled.
    logits = lstm_basic_forward(tokens, q_len, prep)
    jax.block_until_ready(logits)

    assert logits.shape == (B, NUM_CLASSES)
    assert jnp.all(jnp.isfinite(logits))

    ref = reference_forward(tokens, q_len, params)
    assert jnp.allclose(logits, ref, rtol=1e-3, atol=1e-3), (
        float(jnp.max(jnp.abs(logits - ref))))

    print("KERNEL_OK")
</pallas_src>

<mosaic_0001>
module attributes {stable_mosaic.version = 11 : i64} {
  func.func @lstm_classifier_kernel(%arg0: memref<8x8xi32, #tpu.memory_space<smem>>, %arg1: memref<8x1xi32, #tpu.memory_space<vmem>>, %arg2: memref<64x128xf32, #tpu.memory_space<vmem>>, %arg3: memref<32x128xf32, #tpu.memory_space<vmem>>, %arg4: memref<32x256xf32, #tpu.memory_space<vmem>>, %arg5: memref<1x256xf32, #tpu.memory_space<vmem>>, %arg6: memref<256x128xf32, #tpu.memory_space<vmem>>, %arg7: memref<1x128xf32, #tpu.memory_space<vmem>>, %arg8: memref<8x128xf32, #tpu.memory_space<vmem>>, %arg9: memref<8x128xf32, #tpu.memory_space<vmem>>) attributes {dimension_semantics = [], scalar_prefetch = 0 : i64, scratch_operands = 1 : i64, tpu.core_type = #tpu.core_type<tc>} {
    %c0 = arith.constant 0 : index
    %c0_0 = arith.constant 0 : index
    %0 = vector.load %arg1[%c0, %c0_0] : memref<8x1xi32, #tpu.memory_space<vmem>>, vector<8x1xi32>
    %c1_i32 = arith.constant 1 : i32
    %1 = vector.broadcast %c1_i32 : i32 to vector<8x1xi32>
    %2 = arith.subi %0, %1 : vector<8x1xi32>
    %cst = arith.constant 0.000000e+00 : f32
    %3 = vector.broadcast %cst : f32 to vector<8x32xf32>
    %cst_1 = arith.constant 0.000000e+00 : f32
    %4 = vector.broadcast %cst_1 : f32 to vector<8x32xf32>
    %cst_2 = arith.constant 0.000000e+00 : f32
    %5 = vector.broadcast %cst_2 : f32 to vector<8x32xf32>
    %c0_i32 = arith.constant 0 : i32
    %c0_3 = arith.constant 0 : index
    %6 = arith.index_cast %c0_i32 : i32 to index
    %7 = memref.load %arg0[%c0_3, %6] : memref<8x8xi32, #tpu.memory_space<smem>>
    %8 = arith.index_cast %7 : i32 to index
    %c0_4 = arith.constant 0 : index
    %9 = vector.load %arg2[%8, %c0_4] : memref<64x128xf32, #tpu.memory_space<vmem>>, vector<1x128xf32>
    %c0_5 = arith.constant 0 : index
    %c0_6 = arith.constant 0 : index
    %10 = vector.load %arg9[%c0_5, %c0_6] : memref<8x128xf32, #tpu.memory_space<vmem>>, vector<1x128xf32>
    tpu.vector_store %arg9[%c0_5, %c0_6], %9 {strides = array<i32>} : memref<8x128xf32, #tpu.memory_space<vmem>>, vector<1x128xf32>,
    %c1 = arith.constant 1 : index
    %11 = arith.index_cast %c0_i32 : i32 to index
    %12 = memref.load %arg0[%c1, %11] : memref<8x8xi32, #tpu.memory_space<smem>>
    %13 = arith.index_cast %12 : i32 to index
    %c0_7 = arith.constant 0 : index
    %14 = vector.load %arg2[%13, %c0_7] : memref<64x128xf32, #tpu.memory_space<vmem>>, vector<1x128xf32>
    %c1_8 = arith.constant 1 : index
    %c0_9 = arith.constant 0 : index
    %15 = vector.load %arg9[%c1_8, %c0_9] : memref<8x128xf32, #tpu.memory_space<vmem>>, vector<1x128xf32>
    tpu.vector_store %arg9[%c1_8, %c0_9], %14 {strides = array<i32>} : memref<8x128xf32, #tpu.memory_space<vmem>>, vector<1x128xf32>,
    %c2 = arith.constant 2 : index
    %16 = arith.index_cast %c0_i32 : i32 to index
    %17 = memref.load %arg0[%c2, %16] : memref<8x8xi32, #tpu.memory_space<smem>>
    %18 = arith.index_cast %17 : i32 to index
    %c0_10 = arith.constant 0 : index
    %19 = vector.load %arg2[%18, %c0_10] : memref<64x128xf32, #tpu.memory_space<vmem>>, vector<1x128xf32>
    %c2_11 = arith.constant 2 : index
    %c0_12 = arith.constant 0 : index
    %20 = vector.load %arg9[%c2_11, %c0_12] : memref<8x128xf32, #tpu.memory_space<vmem>>, vector<1x128xf32>
    tpu.vector_store %arg9[%c2_11, %c0_12], %19 {strides = array<i32>} : memref<8x128xf32, #tpu.memory_space<vmem>>, vector<1x128xf32>,
    %c3 = arith.constant 3 : index
    %21 = arith.index_cast %c0_i32 : i32 to index
    %22 = memref.load %arg0[%c3, %21] : memref<8x8xi32, #tpu.memory_space<smem>>
    %23 = arith.index_cast %22 : i32 to index
    %c0_13 = arith.constant 0 : index
    %24 = vector.load %arg2[%23, %c0_13] : memref<64x128xf32, #tpu.memory_space<vmem>>, vector<1x128xf32>
    %c3_14 = arith.constant 3 : index
    %c0_15 = arith.constant 0 : index
    %25 = vector.load %arg9[%c3_14, %c0_15] : memref<8x128xf32, #tpu.memory_space<vmem>>, vector<1x128xf32>
    tpu.vector_store %arg9[%c3_14, %c0_15], %24 {strides = array<i32>} : memref<8x128xf32, #tpu.memory_space<vmem>>, vector<1x128xf32>,
    %c4 = arith.constant 4 : index
    %26 = arith.index_cast %c0_i32 : i32 to index
    %27 = memref.load %arg0[%c4, %26] : memref<8x8xi32, #tpu.memory_space<smem>>
    %28 = arith.index_cast %27 : i32 to index
    %c0_16 = arith.constant 0 : index
    %29 = vector.load %arg2[%28, %c0_16] : memref<64x128xf32, #tpu.memory_space<vmem>>, vector<1x128xf32>
    %c4_17 = arith.constant 4 : index
    %c0_18 = arith.constant 0 : index
    %30 = vector.load %arg9[%c4_17, %c0_18] : memref<8x128xf32, #tpu.memory_space<vmem>>, vector<1x128xf32>
    tpu.vector_store %arg9[%c4_17, %c0_18], %29 {strides = array<i32>} : memref<8x128xf32, #tpu.memory_space<vmem>>, vector<1x128xf32>,
    %c5 = arith.constant 5 : index
    %31 = arith.index_cast %c0_i32 : i32 to index
    %32 = memref.load %arg0[%c5, %31] : memref<8x8xi32, #tpu.memory_space<smem>>
    %33 = arith.index_cast %32 : i32 to index
    %c0_19 = arith.constant 0 : index
    %34 = vector.load %arg2[%33, %c0_19] : memref<64x128xf32, #tpu.memory_space<vmem>>, vector<1x128xf32>
    %c5_20 = arith.constant 5 : index
    %c0_21 = arith.constant 0 : index
    %35 = vector.load %arg9[%c5_20, %c0_21] : memref<8x128xf32, #tpu.memory_space<vmem>>, vector<1x128xf32>
    tpu.vector_store %arg9[%c5_20, %c0_21], %34 {strides = array<i32>} : memref<8x128xf32, #tpu.memory_space<vmem>>, vector<1x128xf32>,
    %c6 = arith.constant 6 : index
    %36 = arith.index_cast %c0_i32 : i32 to index
    %37 = memref.load %arg0[%c6, %36] : memref<8x8xi32, #tpu.memory_space<smem>>
    %38 = arith.index_cast %37 : i32 to index
    %c0_22 = arith.constant 0 : index
    %39 = vector.load %arg2[%38, %c0_22] : memref<64x128xf32, #tpu.memory_space<vmem>>, vector<1x128xf32>
    %c6_23 = arith.constant 6 : index
    %c0_24 = arith.constant 0 : index
    %40 = vector.load %arg9[%c6_23, %c0_24] : memref<8x128xf32, #tpu.memory_space<vmem>>, vector<1x128xf32>
    tpu.vector_store %arg9[%c6_23, %c0_24], %39 {strides = array<i32>} : memref<8x128xf32, #tpu.memory_space<vmem>>, vector<1x128xf32>,
    %c7 = arith.constant 7 : index
    %41 = arith.index_cast %c0_i32 : i32 to index
    %42 = memref.load %arg0[%c7, %41] : memref<8x8xi32, #tpu.memory_space<smem>>
    %43 = arith.index_cast %42 : i32 to index
    %c0_25 = arith.constant 0 : index
    %44 = vector.load %arg2[%43, %c0_25] : memref<64x128xf32, #tpu.memory_space<vmem>>, vector<1x128xf32>
    %c7_26 = arith.constant 7 : index
    %c0_27 = arith.constant 0 : index
    %45 = vector.load %arg9[%c7_26, %c0_27] : memref<8x128xf32, #tpu.memory_space<vmem>>, vector<1x128xf32>
    tpu.vector_store %arg9[%c7_26, %c0_27], %44 {strides = array<i32>} : memref<8x128xf32, #tpu.memory_space<vmem>>, vector<1x128xf32>,
    %c0_28 = arith.constant 0 : index
    %c0_29 = arith.constant 0 : index
    %46 = vector.load %arg9[%c0_28, %c0_29] : memref<8x128xf32, #tpu.memory_space<vmem>>, vector<8x128xf32>
    %c0_30 = arith.constant 0 : index
    %c0_31 = arith.constant 0 : index
    %47 = vector.load %arg3[%c0_30, %c0_31] : memref<32x128xf32, #tpu.memory_space<vmem>>, vector<32x128xf32>
    %cst_32 = arith.constant dense<0.000000e+00> : vector<8x128xf32>
    %48 = tpu.matmul %3, %47, %cst_32 {dimension_numbers = #tpu.dot_dimension_numbers<[1], [0], [0], [1], [0, 0, 1, 1], [], []>} : vector<8x32xf32>, vector<32x128xf32>, vector<8x128xf32> -> vector<8x128xf32>
    %49 = arith.addf %46, %48 : vector<8x128xf32>
    %50 = arith.negf %49 : vector<8x128xf32>
    %51 = math.exp %50 : vector<8x128xf32>
    %cst_33 = arith.constant 1.000000e+00 : f32
    %52 = vector.broadcast %cst_33 : f32 to vector<8x128xf32>
    %53 = arith.addf %52, %51 : vector<8x128xf32>
    %54 = arith.divf %52, %53 : vector<8x128xf32>
    %55 = math.tanh %49 : vector<8x128xf32>
    %56 = vector.extract_strided_slice %54 {offsets = [0, 0], sizes = [8, 32], strides = [1, 1]} : vector<8x128xf32> to vector<8x32xf32>
    %57 = vector.extract_strided_slice %54 {offsets = [0, 32], sizes = [8, 32], strides = [1, 1]} : vector<8x128xf32> to vector<8x32xf32>
    %58 = vector.extract_strided_slice %55 {offsets = [0, 64], sizes = [8, 32], strides = [1, 1]} : vector<8x128xf32> to vector<8x32xf32>
    %59 = vector.extract_strided_slice %54 {offsets = [0, 96], sizes = [8, 32], strides = [1, 1]} : vector<8x128xf32> to vector<8x32xf32>
    %60 = arith.mulf %57, %4 : vector<8x32xf32>
    %61 = arith.mulf %56, %58 : vector<8x32xf32>
    %62 = arith.addf %60, %61 : vector<8x32xf32>
    %63 = math.tanh %62 : vector<8x32xf32>
    %64 = arith.mulf %59, %63 : vector<8x32xf32>
    %65 = vector.broadcast %c0_i32 : i32 to vector<8x1xi32>
    %66 = arith.cmpi eq, %2, %65 : vector<8x1xi32>
    %67 = vector.shape_cast %66 : vector<8x1xi1> to vector<8x1xi1>
    %68 = vector.broadcast %67 : vector<8x1xi1> to vector<8x32xi1>
    %69 = arith.select %68, %64, %5 : vector<8x32xi1>, vector<8x32xf32>
    %c1_i32_34 = arith.constant 1 : i32
    %c0_35 = arith.constant 0 : index
    %70 = arith.index_cast %c1_i32_34 : i32 to index
    %71 = memref.load %arg0[%c0_35, %70] : memref<8x8xi32, #tpu.memory_space<smem>>
    %72 = arith.index_cast %71 : i32 to index
    %c0_36 = arith.constant 0 : index
    %73 = vector.load %arg2[%72, %c0_36] : memref<64x128xf32, #tpu.memory_space<vmem>>, vector<1x128xf32>
    %c0_37 = arith.constant 0 : index
    %c0_38 = arith.constant 0 : index
    %74 = vector.load %arg9[%c0_37, %c0_38] : memref<8x128xf32, #tpu.memory_space<vmem>>, vector<1x128xf32>
    tpu.vector_store %arg9[%c0_37, %c0_38], %73 {strides = array<i32>} : memref<8x128xf32, #tpu.memory_space<vmem>>, vector<1x128xf32>,
    %c1_39 = arith.constant 1 : index
    %75 = arith.index_cast %c1_i32_34 : i32 to index
    %76 = memref.load %arg0[%c1_39, %75] : memref<8x8xi32, #tpu.memory_space<smem>>
    %77 = arith.index_cast %76 : i32 to index
    %c0_40 = arith.constant 0 : index
    %78 = vector.load %arg2[%77, %c0_40] : memref<64x128xf32, #tpu.memory_space<vmem>>, vector<1x128xf32>
    %c1_41 = arith.constant 1 : index
    %c0_42 = arith.constant 0 : index
    %79 = vector.load %arg9[%c1_41, %c0_42] : memref<8x128xf32, #tpu.memory_space<vmem>>, vector<1x128xf32>
    tpu.vector_store %arg9[%c1_41, %c0_42], %78 {strides = array<i32>} : memref<8x128xf32, #tpu.memory_space<vmem>>, vector<1x128xf32>,
    %c2_43 = arith.constant 2 : index
    %80 = arith.index_cast %c1_i32_34 : i32 to index
    %81 = memref.load %arg0[%c2_43, %80] : memref<8x8xi32, #tpu.memory_space<smem>>
    %82 = arith.index_cast %81 : i32 to index
    %c0_44 = arith.constant 0 : index
    %83 = vector.load %arg2[%82, %c0_44] : memref<64x128xf32, #tpu.memory_space<vmem>>, vector<1x128xf32>
    %c2_45 = arith.constant 2 : index
    %c0_46 = arith.constant 0 : index
    %84 = vector.load %arg9[%c2_45, %c0_46] : memref<8x128xf32, #tpu.memory_space<vmem>>, vector<1x128xf32>
    tpu.vector_store %arg9[%c2_45, %c0_46], %83 {strides = array<i32>} : memref<8x128xf32, #tpu.memory_space<vmem>>, vector<1x128xf32>,
    %c3_47 = arith.constant 3 : index
    %85 = arith.index_cast %c1_i32_34 : i32 to index
    %86 = memref.load %arg0[%c3_47, %85] : memref<8x8xi32, #tpu.memory_space<smem>>
    %87 = arith.index_cast %86 : i32 to index
    %c0_48 = arith.constant 0 : index
    %88 = vector.load %arg2[%87, %c0_48] : memref<64x128xf32, #tpu.memory_space<vmem>>, vector<1x128xf32>
    %c3_49 = arith.constant 3 : index
    %c0_50 = arith.constant 0 : index
    %89 = vector.load %arg9[%c3_49, %c0_50] : memref<8x128xf32, #tpu.memory_space<vmem>>, vector<1x128xf32>
    tpu.vector_store %arg9[%c3_49, %c0_50], %88 {strides = array<i32>} : memref<8x128xf32, #tpu.memory_space<vmem>>, vector<1x128xf32>,
    %c4_51 = arith.constant 4 : index
    %90 = arith.index_cast %c1_i32_34 : i32 to index
    %91 = memref.load %arg0[%c4_51, %90] : memref<8x8xi32, #tpu.memory_space<smem>>
    %92 = arith.index_cast %91 : i32 to index
    %c0_52 = arith.constant 0 : index
    %93 = vector.load %arg2[%92, %c0_52] : memref<64x128xf32, #tpu.memory_space<vmem>>, vector<1x128xf32>
    %c4_53 = arith.constant 4 : index
    %c0_54 = arith.constant 0 : index
    %94 = vector.load %arg9[%c4_53, %c0_54] : memref<8x128xf32, #tpu.memory_space<vmem>>, vector<1x128xf32>
    tpu.vector_store %arg9[%c4_53, %c0_54], %93 {strides = array<i32>} : memref<8x128xf32, #tpu.memory_space<vmem>>, vector<1x128xf32>,
    %c5_55 = arith.constant 5 : index
    %95 = arith.index_cast %c1_i32_34 : i32 to index
    %96 = memref.load %arg0[%c5_55, %95] : memref<8x8xi32, #tpu.memory_space<smem>>
    %97 = arith.index_cast %96 : i32 to index
    %c0_56 = arith.constant 0 : index
    %98 = vector.load %arg2[%97, %c0_56] : memref<64x128xf32, #tpu.memory_space<vmem>>, vector<1x128xf32>
    %c5_57 = arith.constant 5 : index
    %c0_58 = arith.constant 0 : index
    %99 = vector.load %arg9[%c5_57, %c0_58] : memref<8x128xf32, #tpu.memory_space<vmem>>, vector<1x128xf32>
    tpu.vector_store %arg9[%c5_57, %c0_58], %98 {strides = array<i32>} : memref<8x128xf32, #tpu.memory_space<vmem>>, vector<1x128xf32>,
    %c6_59 = arith.constant 6 : index
    %100 = arith.index_cast %c1_i32_34 : i32 to index
    %101 = memref.load %arg0[%c6_59, %100] : memref<8x8xi32, #tpu.memory_space<smem>>
    %102 = arith.index_cast %101 : i32 to index
    %c0_60 = arith.constant 0 : index
    %103 = vector.load %arg2[%102, %c0_60] : memref<64x128xf32, #tpu.memory_space<vmem>>, vector<1x128xf32>
    %c6_61 = arith.constant 6 : index
    %c0_62 = arith.constant 0 : index
    %104 = vector.load %arg9[%c6_61, %c0_62] : memref<8x128xf32, #tpu.memory_space<vmem>>, vector<1x128xf32>
    tpu.vector_store %arg9[%c6_61, %c0_62], %103 {strides = array<i32>} : memref<8x128xf32, #tpu.memory_space<vmem>>, vector<1x128xf32>,
    %c7_63 = arith.constant 7 : index
    %105 = arith.index_cast %c1_i32_34 : i32 to index
    %106 = memref.load %arg0[%c7_63, %105] : memref<8x8xi32, #tpu.memory_space<smem>>
    %107 = arith.index_cast %106 : i32 to index
    %c0_64 = arith.constant 0 : index
    %108 = vector.load %arg2[%107, %c0_64] : memref<64x128xf32, #tpu.memory_space<vmem>>, vector<1x128xf32>
    %c7_65 = arith.constant 7 : index
    %c0_66 = arith.constant 0 : index
    %109 = vector.load %arg9[%c7_65, %c0_66] : memref<8x128xf32, #tpu.memory_space<vmem>>, vector<1x128xf32>
    tpu.vector_store %arg9[%c7_65, %c0_66], %108 {strides = array<i32>} : memref<8x128xf32, #tpu.memory_space<vmem>>, vector<1x128xf32>,
    %c0_67 = arith.constant 0 : index
    %c0_68 = arith.constant 0 : index
    %110 = vector.load %arg9[%c0_67, %c0_68] : memref<8x128xf32, #tpu.memory_space<vmem>>, vector<8x128xf32>
    %c0_69 = arith.constant 0 : index
    %c0_70 = arith.constant 0 : index
    %111 = vector.load %arg3[%c0_69, %c0_70] : memref<32x128xf32, #tpu.memory_space<vmem>>, vector<32x128xf32>
    %cst_71 = arith.constant dense<0.000000e+00> : vector<8x128xf32>
    %112 = tpu.matmul %64, %111, %cst_71 {dimension_numbers = #tpu.dot_dimension_numbers<[1], [0], [0], [1], [0, 0, 1, 1], [], []>} : vector<8x32xf32>, vector<32x128xf32>, vector<8x128xf32> -> vector<8x128xf32>
    %113 = arith.addf %110, %112 : vector<8x128xf32>
    %114 = arith.negf %113 : vector<8x128xf32>
    %115 = math.exp %114 : vector<8x128xf32>
    %cst_72 = arith.constant 1.000000e+00 : f32
    %116 = vector.broadcast %cst_72 : f32 to vector<8x128xf32>
    %117 = arith.addf %116, %115 : vector<8x128xf32>
    %118 = arith.divf %116, %117 : vector<8x128xf32>
    %119 = math.tanh %113 : vector<8x128xf32>
    %120 = vector.extract_strided_slice %118 {offsets = [0, 0], sizes = [8, 32], strides = [1, 1]} : vector<8x128xf32> to vector<8x32xf32>
    %121 = vector.extract_strided_slice %118 {offsets = [0, 32], sizes = [8, 32], strides = [1, 1]} : vector<8x128xf32> to vector<8x32xf32>
    %122 = vector.extract_strided_slice %119 {offsets = [0, 64], sizes = [8, 32], strides = [1, 1]} : vector<8x128xf32> to vector<8x32xf32>
    %123 = vector.extract_strided_slice %118 {offsets = [0, 96], sizes = [8, 32], strides = [1, 1]} : vector<8x128xf32> to vector<8x32xf32>
    %124 = arith.mulf %121, %62 : vector<8x32xf32>
    %125 = arith.mulf %120, %122 : vector<8x32xf32>
    %126 = arith.addf %124, %125 : vector<8x32xf32>
    %127 = math.tanh %126 : vector<8x32xf32>
    %128 = arith.mulf %123, %127 : vector<8x32xf32>
    %129 = vector.broadcast %c1_i32_34 : i32 to vector<8x1xi32>
    %130 = arith.cmpi eq, %2, %129 : vector<8x1xi32>
    %131 = vector.shape_cast %130 : vector<8x1xi1> to vector<8x1xi1>
    %132 = vector.broadcast %131 : vector<8x1xi1> to vector<8x32xi1>
    %133 = arith.select %132, %128, %69 : vector<8x32xi1>, vector<8x32xf32>
    %c2_i32 = arith.constant 2 : i32
    %c0_73 = arith.constant 0 : index
    %134 = arith.index_cast %c2_i32 : i32 to index
    %135 = memref.load %arg0[%c0_73, %134] : memref<8x8xi32, #tpu.memory_space<smem>>
    %136 = arith.index_cast %135 : i32 to index
    %c0_74 = arith.constant 0 : index
    %137 = vector.load %arg2[%136, %c0_74] : memref<64x128xf32, #tpu.memory_space<vmem>>, vector<1x128xf32>
    %c0_75 = arith.constant 0 : index
    %c0_76 = arith.constant 0 : index
    %138 = vector.load %arg9[%c0_75, %c0_76] : memref<8x128xf32, #tpu.memory_space<vmem>>, vector<1x128xf32>
    tpu.vector_store %arg9[%c0_75, %c0_76], %137 {strides = array<i32>} : memref<8x128xf32, #tpu.memory_space<vmem>>, vector<1x128xf32>,
    %c1_77 = arith.constant 1 : index
    %139 = arith.index_cast %c2_i32 : i32 to index
    %140 = memref.load %arg0[%c1_77, %139] : memref<8x8xi32, #tpu.memory_space<smem>>
    %141 = arith.index_cast %140 : i32 to index
    %c0_78 = arith.constant 0 : index
    %142 = vector.load %arg2[%141, %c0_78] : memref<64x128xf32, #tpu.memory_space<vmem>>, vector<1x128xf32>
    %c1_79 = arith.constant 1 : index
    %c0_80 = arith.constant 0 : index
    %143 = vector.load %arg9[%c1_79, %c0_80] : memref<8x128xf32, #tpu.memory_space<vmem>>, vector<1x128xf32>
    tpu.vector_store %arg9[%c1_79, %c0_80], %142 {strides = array<i32>} : memref<8x128xf32, #tpu.memory_space<vmem>>, vector<1x128xf32>,
    %c2_81 = arith.constant 2 : index
    %144 = arith.index_cast %c2_i32 : i32 to index
    %145 = memref.load %arg0[%c2_81, %144] : memref<8x8xi32, #tpu.memory_space<smem>>
    %146 = arith.index_cast %145 : i32 to index
    %c0_82 = arith.constant 0 : index
    %147 = vector.load %arg2[%146, %c0_82] : memref<64x128xf32, #tpu.memory_space<vmem>>, vector<1x128xf32>
    %c2_83 = arith.constant 2 : index
    %c0_84 = arith.constant 0 : index
    %148 = vector.load %arg9[%c2_83, %c0_84] : memref<8x128xf32, #tpu.memory_space<vmem>>, vector<1x128xf32>
    tpu.vector_store %arg9[%c2_83, %c0_84], %147 {strides = array<i32>} : memref<8x128xf32, #tpu.memory_space<vmem>>, vector<1x128xf32>,
    %c3_85 = arith.constant 3 : index
    %149 = arith.index_cast %c2_i32 : i32 to index
    %150 = memref.load %arg0[%c3_85, %149] : memref<8x8xi32, #tpu.memory_space<smem>>
    %151 = arith.index_cast %150 : i32 to index
    %c0_86 = arith.constant 0 : index
    %152 = vector.load %arg2[%151, %c0_86] : memref<64x128xf32, #tpu.memory_space<vmem>>, vector<1x128xf32>
    %c3_87 = arith.constant 3 : index
    %c0_88 = arith.constant 0 : index
    %153 = vector.load %arg9[%c3_87, %c0_88] : memref<8x128xf32, #tpu.memory_space<vmem>>, vector<1x128xf32>
    tpu.vector_store %arg9[%c3_87, %c0_88], %152 {strides = array<i32>} : memref<8x128xf32, #tpu.memory_space<vmem>>, vector<1x128xf32>,
    %c4_89 = arith.constant 4 : index
    %154 = arith.index_cast %c2_i32 : i32 to index
    %155 = memref.load %arg0[%c4_89, %154] : memref<8x8xi32, #tpu.memory_space<smem>>
    %156 = arith.index_cast %155 : i32 to index
    %c0_90 = arith.constant 0 : index
    %157 = vector.load %arg2[%156, %c0_90] : memref<64x128xf32, #tpu.memory_space<vmem>>, vector<1x128xf32>
    %c4_91 = arith.constant 4 : index
    %c0_92 = arith.constant 0 : index
    %158 = vector.load %arg9[%c4_91, %c0_92] : memref<8x128xf32, #tpu.memory_space<vmem>>, vector<1x128xf32>
    tpu.vector_store %arg9[%c4_91, %c0_92], %157 {strides = array<i32>} : memref<8x128xf32, #tpu.memory_space<vmem>>, vector<1x128xf32>,
    %c5_93 = arith.constant 5 : index
    %159 = arith.index_cast %c2_i32 : i32 to index
    %160 = memref.load %arg0[%c5_93, %159] : memref<8x8xi32, #tpu.memory_space<smem>>
    %161 = arith.index_cast %160 : i32 to index
    %c0_94 = arith.constant 0 : index
    %162 = vector.load %arg2[%161, %c0_94] : memref<64x128xf32, #tpu.memory_space<vmem>>, vector<1x128xf32>
    %c5_95 = arith.constant 5 : index
    %c0_96 = arith.constant 0 : index
    %163 = vector.load %arg9[%c5_95, %c0_96] : memref<8x128xf32, #tpu.memory_space<vmem>>, vector<1x128xf32>
    tpu.vector_store %arg9[%c5_95, %c0_96], %162 {strides = array<i32>} : memref<8x128xf32, #tpu.memory_space<vmem>>, vector<1x128xf32>,
    %c6_97 = arith.constant 6 : index
    %164 = arith.index_cast %c2_i32 : i32 to index
    %165 = memref.load %arg0[%c6_97, %164] : memref<8x8xi32, #tpu.memory_space<smem>>
    %166 = arith.index_cast %165 : i32 to index
    %c0_98 = arith.constant 0 : index
    %167 = vector.load %arg2[%166, %c0_98] : memref<64x128xf32, #tpu.memory_space<vmem>>, vector<1x128xf32>
    %c6_99 = arith.constant 6 : index
    %c0_100 = arith.constant 0 : index
    %168 = vector.load %arg9[%c6_99, %c0_100] : memref<8x128xf32, #tpu.memory_space<vmem>>, vector<1x128xf32>
    tpu.vector_store %arg9[%c6_99, %c0_100], %167 {strides = array<i32>} : memref<8x128xf32, #tpu.memory_space<vmem>>, vector<1x128xf32>,
    %c7_101 = arith.constant 7 : index
    %169 = arith.index_cast %c2_i32 : i32 to index
    %170 = memref.load %arg0[%c7_101, %169] : memref<8x8xi32, #tpu.memory_space<smem>>
    %171 = arith.index_cast %170 : i32 to index
    %c0_102 = arith.constant 0 : index
    %172 = vector.load %arg2[%171, %c0_102] : memref<64x128xf32, #tpu.memory_space<vmem>>, vector<1x128xf32>
    %c7_103 = arith.constant 7 : index
    %c0_104 = arith.constant 0 : index
    %173 = vector.load %arg9[%c7_103, %c0_104] : memref<8x128xf32, #tpu.memory_space<vmem>>, vector<1x128xf32>
    tpu.vector_store %arg9[%c7_103, %c0_104], %172 {strides = array<i32>} : memref<8x128xf32, #tpu.memory_space<vmem>>, vector<1x128xf32>,
    %c0_105 = arith.constant 0 : index
    %c0_106 = arith.constant 0 : index
    %174 = vector.load %arg9[%c0_105, %c0_106] : memref<8x128xf32, #tpu.memory_space<vmem>>, vector<8x128xf32>
    %c0_107 = arith.constant 0 : index
    %c0_108 = arith.constant 0 : index
    %175 = vector.load %arg3[%c0_107, %c0_108] : memref<32x128xf32, #tpu.memory_space<vmem>>, vector<32x128xf32>
    %cst_109 = arith.constant dense<0.000000e+00> : vector<8x128xf32>
    %176 = tpu.matmul %128, %175, %cst_109 {dimension_numbers = #tpu.dot_dimension_numbers<[1], [0], [0], [1], [0, 0, 1, 1], [], []>} : vector<8x32xf32>, vector<32x128xf32>, vector<8x128xf32> -> vector<8x128xf32>
    %177 = arith.addf %174, %176 : vector<8x128xf32>
    %178 = arith.negf %177 : vector<8x128xf32>
    %179 = math.exp %178 : vector<8x128xf32>
    %cst_110 = arith.constant 1.000000e+00 : f32
    %180 = vector.broadcast %cst_110 : f32 to vector<8x128xf32>
    %181 = arith.addf %180, %179 : vector<8x128xf32>
    %182 = arith.divf %180, %181 : vector<8x128xf32>
    %183 = math.tanh %177 : vector<8x128xf32>
    %184 = vector.extract_strided_slice %182 {offsets = [0, 0], sizes = [8, 32], strides = [1, 1]} : vector<8x128xf32> to vector<8x32xf32>
    %185 = vector.extract_strided_slice %182 {offsets = [0, 32], sizes = [8, 32], strides = [1, 1]} : vector<8x128xf32> to vector<8x32xf32>
    %186 = vector.extract_strided_slice %183 {offsets = [0, 64], sizes = [8, 32], strides = [1, 1]} : vector<8x128xf32> to vector<8x32xf32>
    %187 = vector.extract_strided_slice %182 {offsets = [0, 96], sizes = [8, 32], strides = [1, 1]} : vector<8x128xf32> to vector<8x32xf32>
    %188 = arith.mulf %185, %126 : vector<8x32xf32>
    %189 = arith.mulf %184, %186 : vector<8x32xf32>
    %190 = arith.addf %188, %189 : vector<8x32xf32>
    %191 = math.tanh %190 : vector<8x32xf32>
    %192 = arith.mulf %187, %191 : vector<8x32xf32>
    %193 = vector.broadcast %c2_i32 : i32 to vector<8x1xi32>
    %194 = arith.cmpi eq, %2, %193 : vector<8x1xi32>
    %195 = vector.shape_cast %194 : vector<8x1xi1> to vector<8x1xi1>
    %196 = vector.broadcast %195 : vector<8x1xi1> to vector<8x32xi1>
    %197 = arith.select %196, %192, %133 : vector<8x32xi1>, vector<8x32xf32>
    %c3_i32 = arith.constant 3 : i32
    %c0_111 = arith.constant 0 : index
    %198 = arith.index_cast %c3_i32 : i32 to index
    %199 = memref.load %arg0[%c0_111, %198] : memref<8x8xi32, #tpu.memory_space<smem>>
    %200 = arith.index_cast %199 : i32 to index
    %c0_112 = arith.constant 0 : index
    %201 = vector.load %arg2[%200, %c0_112] : memref<64x128xf32, #tpu.memory_space<vmem>>, vector<1x128xf32>
    %c0_113 = arith.constant 0 : index
    %c0_114 = arith.constant 0 : index
    %202 = vector.load %arg9[%c0_113, %c0_114] : memref<8x128xf32, #tpu.memory_space<vmem>>, vector<1x128xf32>
    tpu.vector_store %arg9[%c0_113, %c0_114], %201 {strides = array<i32>} : memref<8x128xf32, #tpu.memory_space<vmem>>, vector<1x128xf32>,
    %c1_115 = arith.constant 1 : index
    %203 = arith.index_cast %c3_i32 : i32 to index
    %204 = memref.load %arg0[%c1_115, %203] : memref<8x8xi32, #tpu.memory_space<smem>>
    %205 = arith.index_cast %204 : i32 to index
    %c0_116 = arith.constant 0 : index
    %206 = vector.load %arg2[%205, %c0_116] : memref<64x128xf32, #tpu.memory_space<vmem>>, vector<1x128xf32>
    %c1_117 = arith.constant 1 : index
    %c0_118 = arith.constant 0 : index
    %207 = vector.load %arg9[%c1_117, %c0_118] : memref<8x128xf32, #tpu.memory_space<vmem>>, vector<1x128xf32>
    tpu.vector_store %arg9[%c1_117, %c0_118], %206 {strides = array<i32>} : memref<8x128xf32, #tpu.memory_space<vmem>>, vector<1x128xf32>,
    %c2_119 = arith.constant 2 : index
    %208 = arith.index_cast %c3_i32 : i32 to index
    %209 = memref.load %arg0[%c2_119, %208] : memref<8x8xi32, #tpu.memory_space<smem>>
    %210 = arith.index_cast %209 : i32 to index
    %c0_120 = arith.constant 0 : index
    %211 = vector.load %arg2[%210, %c0_120] : memref<64x128xf32, #tpu.memory_space<vmem>>, vector<1x128xf32>
    %c2_121 = arith.constant 2 : index
    %c0_122 = arith.constant 0 : index
    %212 = vector.load %arg9[%c2_121, %c0_122] : memref<8x128xf32, #tpu.memory_space<vmem>>, vector<1x128xf32>
    tpu.vector_store %arg9[%c2_121, %c0_122], %211 {strides = array<i32>} : memref<8x128xf32, #tpu.memory_space<vmem>>, vector<1x128xf32>,
    %c3_123 = arith.constant 3 : index
    %213 = arith.index_cast %c3_i32 : i32 to index
    %214 = memref.load %arg0[%c3_123, %213] : memref<8x8xi32, #tpu.memory_space<smem>>
    %215 = arith.index_cast %214 : i32 to index
    %c0_124 = arith.constant 0 : index
    %216 = vector.load %arg2[%215, %c0_124] : memref<64x128xf32, #tpu.memory_space<vmem>>, vector<1x128xf32>
    %c3_125 = arith.constant 3 : index
    %c0_126 = arith.constant 0 : index
    %217 = vector.load %arg9[%c3_125, %c0_126] : memref<8x128xf32, #tpu.memory_space<vmem>>, vector<1x128xf32>
    tpu.vector_store %arg9[%c3_125, %c0_126], %216 {strides = array<i32>} : memref<8x128xf32, #tpu.memory_space<vmem>>, vector<1x128xf32>,
    %c4_127 = arith.constant 4 : index
    %218 = arith.index_cast %c3_i32 : i32 to index
    %219 = memref.load %arg0[%c4_127, %218] : memref<8x8xi32, #tpu.memory_space<smem>>
    %220 = arith.index_cast %219 : i32 to index
    %c0_128 = arith.constant 0 : index
    %221 = vector.load %arg2[%220, %c0_128] : memref<64x128xf32, #tpu.memory_space<vmem>>, vector<1x128xf32>
    %c4_129 = arith.constant 4 : index
    %c0_130 = arith.constant 0 : index
    %222 = vector.load %arg9[%c4_129, %c0_130] : memref<8x128xf32, #tpu.memory_space<vmem>>, vector<1x128xf32>
    tpu.vector_store %arg9[%c4_129, %c0_130], %221 {strides = array<i32>} : memref<8x128xf32, #tpu.memory_space<vmem>>, vector<1x128xf32>,
    %c5_131 = arith.constant 5 : index
    %223 = arith.index_cast %c3_i32 : i32 to index
    %224 = memref.load %arg0[%c5_131, %223] : memref<8x8xi32, #tpu.memory_space<smem>>
    %225 = arith.index_cast %224 : i32 to index
    %c0_132 = arith.constant 0 : index
    %226 = vector.load %arg2[%225, %c0_132] : memref<64x128xf32, #tpu.memory_space<vmem>>, vector<1x128xf32>
    %c5_133 = arith.constant 5 : index
    %c0_134 = arith.constant 0 : index
    %227 = vector.load %arg9[%c5_133, %c0_134] : memref<8x128xf32, #tpu.memory_space<vmem>>, vector<1x128xf32>
    tpu.vector_store %arg9[%c5_133, %c0_134], %226 {strides = array<i32>} : memref<8x128xf32, #tpu.memory_space<vmem>>, vector<1x128xf32>,
    %c6_135 = arith.constant 6 : index
    %228 = arith.index_cast %c3_i32 : i32 to index
    %229 = memref.load %arg0[%c6_135, %228] : memref<8x8xi32, #tpu.memory_space<smem>>
    %230 = arith.index_cast %229 : i32 to index
    %c0_136 = arith.constant 0 : index
    %231 = vector.load %arg2[%230, %c0_136] : memref<64x128xf32, #tpu.memory_space<vmem>>, vector<1x128xf32>
    %c6_137 = arith.constant 6 : index
    %c0_138 = arith.constant 0 : index
    %232 = vector.load %arg9[%c6_137, %c0_138] : memref<8x128xf32, #tpu.memory_space<vmem>>, vector<1x128xf32>
    tpu.vector_store %arg9[%c6_137, %c0_138], %231 {strides = array<i32>} : memref<8x128xf32, #tpu.memory_space<vmem>>, vector<1x128xf32>,
    %c7_139 = arith.constant 7 : index
    %233 = arith.index_cast %c3_i32 : i32 to index
    %234 = memref.load %arg0[%c7_139, %233] : memref<8x8xi32, #tpu.memory_space<smem>>
    %235 = arith.index_cast %234 : i32 to index
    %c0_140 = arith.constant 0 : index
    %236 = vector.load %arg2[%235, %c0_140] : memref<64x128xf32, #tpu.memory_space<vmem>>, vector<1x128xf32>
    %c7_141 = arith.constant 7 : index
    %c0_142 = arith.constant 0 : index
    %237 = vector.load %arg9[%c7_141, %c0_142] : memref<8x128xf32, #tpu.memory_space<vmem>>, vector<1x128xf32>
    tpu.vector_store %arg9[%c7_141, %c0_142], %236 {strides = array<i32>} : memref<8x128xf32, #tpu.memory_space<vmem>>, vector<1x128xf32>,
    %c0_143 = arith.constant 0 : index
    %c0_144 = arith.constant 0 : index
    %238 = vector.load %arg9[%c0_143, %c0_144] : memref<8x128xf32, #tpu.memory_space<vmem>>, vector<8x128xf32>
    %c0_145 = arith.constant 0 : index
    %c0_146 = arith.constant 0 : index
    %239 = vector.load %arg3[%c0_145, %c0_146] : memref<32x128xf32, #tpu.memory_space<vmem>>, vector<32x128xf32>
    %cst_147 = arith.constant dense<0.000000e+00> : vector<8x128xf32>
    %240 = tpu.matmul %192, %239, %cst_147 {dimension_numbers = #tpu.dot_dimension_numbers<[1], [0], [0], [1], [0, 0, 1, 1], [], []>} : vector<8x32xf32>, vector<32x128xf32>, vector<8x128xf32> -> vector<8x128xf32>
    %241 = arith.addf %238, %240 : vector<8x128xf32>
    %242 = arith.negf %241 : vector<8x128xf32>
    %243 = math.exp %242 : vector<8x128xf32>
    %cst_148 = arith.constant 1.000000e+00 : f32
    %244 = vector.broadcast %cst_148 : f32 to vector<8x128xf32>
    %245 = arith.addf %244, %243 : vector<8x128xf32>
    %246 = arith.divf %244, %245 : vector<8x128xf32>
    %247 = math.tanh %241 : vector<8x128xf32>
    %248 = vector.extract_strided_slice %246 {offsets = [0, 0], sizes = [8, 32], strides = [1, 1]} : vector<8x128xf32> to vector<8x32xf32>
    %249 = vector.extract_strided_slice %246 {offsets = [0, 32], sizes = [8, 32], strides = [1, 1]} : vector<8x128xf32> to vector<8x32xf32>
    %250 = vector.extract_strided_slice %247 {offsets = [0, 64], sizes = [8, 32], strides = [1, 1]} : vector<8x128xf32> to vector<8x32xf32>
    %251 = vector.extract_strided_slice %246 {offsets = [0, 96], sizes = [8, 32], strides = [1, 1]} : vector<8x128xf32> to vector<8x32xf32>
    %252 = arith.mulf %249, %190 : vector<8x32xf32>
    %253 = arith.mulf %248, %250 : vector<8x32xf32>
    %254 = arith.addf %252, %253 : vector<8x32xf32>
    %255 = math.tanh %254 : vector<8x32xf32>
    %256 = arith.mulf %251, %255 : vector<8x32xf32>
    %257 = vector.broadcast %c3_i32 : i32 to vector<8x1xi32>
    %258 = arith.cmpi eq, %2, %257 : vector<8x1xi32>
    %259 = vector.shape_cast %258 : vector<8x1xi1> to vector<8x1xi1>
    %260 = vector.broadcast %259 : vector<8x1xi1> to vector<8x32xi1>
    %261 = arith.select %260, %256, %197 : vector<8x32xi1>, vector<8x32xf32>
    %c4_i32 = arith.constant 4 : i32
    %c0_149 = arith.constant 0 : index
    %262 = arith.index_cast %c4_i32 : i32 to index
    %263 = memref.load %arg0[%c0_149, %262] : memref<8x8xi32, #tpu.memory_space<smem>>
    %264 = arith.index_cast %263 : i32 to index
    %c0_150 = arith.constant 0 : index
    %265 = vector.load %arg2[%264, %c0_150] : memref<64x128xf32, #tpu.memory_space<vmem>>, vector<1x128xf32>
    %c0_151 = arith.constant 0 : index
    %c0_152 = arith.constant 0 : index
    %266 = vector.load %arg9[%c0_151, %c0_152] : memref<8x128xf32, #tpu.memory_space<vmem>>, vector<1x128xf32>
    tpu.vector_store %arg9[%c0_151, %c0_152], %265 {strides = array<i32>} : memref<8x128xf32, #tpu.memory_space<vmem>>, vector<1x128xf32>,
    %c1_153 = arith.constant 1 : index
    %267 = arith.index_cast %c4_i32 : i32 to index
    %268 = memref.load %arg0[%c1_153, %267] : memref<8x8xi32, #tpu.memory_space<smem>>
    %269 = arith.index_cast %268 : i32 to index
    %c0_154 = arith.constant 0 : index
    %270 = vector.load %arg2[%269, %c0_154] : memref<64x128xf32, #tpu.memory_space<vmem>>, vector<1x128xf32>
    %c1_155 = arith.constant 1 : index
    %c0_156 = arith.constant 0 : index
    %271 = vector.load %arg9[%c1_155, %c0_156] : memref<8x128xf32, #tpu.memory_space<vmem>>, vector<1x128xf32>
    tpu.vector_store %arg9[%c1_155, %c0_156], %270 {strides = array<i32>} : memref<8x128xf32, #tpu.memory_space<vmem>>, vector<1x128xf32>,
    %c2_157 = arith.constant 2 : index
    %272 = arith.index_cast %c4_i32 : i32 to index
    %273 = memref.load %arg0[%c2_157, %272] : memref<8x8xi32, #tpu.memory_space<smem>>
    %274 = arith.index_cast %273 : i32 to index
    %c0_158 = arith.constant 0 : index
    %275 = vector.load %arg2[%274, %c0_158] : memref<64x128xf32, #tpu.memory_space<vmem>>, vector<1x128xf32>
    %c2_159 = arith.constant 2 : index
    %c0_160 = arith.constant 0 : index
    %276 = vector.load %arg9[%c2_159, %c0_160] : memref<8x128xf32, #tpu.memory_space<vmem>>, vector<1x128xf32>
    tpu.vector_store %arg9[%c2_159, %c0_160], %275 {strides = array<i32>} : memref<8x128xf32, #tpu.memory_space<vmem>>, vector<1x128xf32>,
    %c3_161 = arith.constant 3 : index
    %277 = arith.index_cast %c4_i32 : i32 to index
    %278 = memref.load %arg0[%c3_161, %277] : memref<8x8xi32, #tpu.memory_space<smem>>
    %279 = arith.index_cast %278 : i32 to index
    %c0_162 = arith.constant 0 : index
    %280 = vector.load %arg2[%279, %c0_162] : memref<64x128xf32, #tpu.memory_space<vmem>>, vector<1x128xf32>
    %c3_163 = arith.constant 3 : index
    %c0_164 = arith.constant 0 : index
    %281 = vector.load %arg9[%c3_163, %c0_164] : memref<8x128xf32, #tpu.memory_space<vmem>>, vector<1x128xf32>
    tpu.vector_store %arg9[%c3_163, %c0_164], %280 {strides = array<i32>} : memref<8x128xf32, #tpu.memory_space<vmem>>, vector<1x128xf32>,
    %c4_165 = arith.constant 4 : index
    %282 = arith.index_cast %c4_i32 : i32 to index
    %283 = memref.load %arg0[%c4_165, %282] : memref<8x8xi32, #tpu.memory_space<smem>>
    %284 = arith.index_cast %283 : i32 to index
    %c0_166 = arith.constant 0 : index
    %285 = vector.load %arg2[%284, %c0_166] : memref<64x128xf32, #tpu.memory_space<vmem>>, vector<1x128xf32>
    %c4_167 = arith.constant 4 : index
    %c0_168 = arith.constant 0 : index
    %286 = vector.load %arg9[%c4_167, %c0_168] : memref<8x128xf32, #tpu.memory_space<vmem>>, vector<1x128xf32>
    tpu.vector_store %arg9[%c4_167, %c0_168], %285 {strides = array<i32>} : memref<8x128xf32, #tpu.memory_space<vmem>>, vector<1x128xf32>,
    %c5_169 = arith.constant 5 : index
    %287 = arith.index_cast %c4_i32 : i32 to index
    %288 = memref.load %arg0[%c5_169, %287] : memref<8x8xi32, #tpu.memory_space<smem>>
    %289 = arith.index_cast %288 : i32 to index
    %c0_170 = arith.constant 0 : index
    %290 = vector.load %arg2[%289, %c0_170] : memref<64x128xf32, #tpu.memory_space<vmem>>, vector<1x128xf32>
    %c5_171 = arith.constant 5 : index
    %c0_172 = arith.constant 0 : index
    %291 = vector.load %arg9[%c5_171, %c0_172] : memref<8x128xf32, #tpu.memory_space<vmem>>, vector<1x128xf32>
    tpu.vector_store %arg9[%c5_171, %c0_172], %290 {strides = array<i32>} : memref<8x128xf32, #tpu.memory_space<vmem>>, vector<1x128xf32>,
    %c6_173 = arith.constant 6 : index
    %292 = arith.index_cast %c4_i32 : i32 to index
    %293 = memref.load %arg0[%c6_173, %292] : memref<8x8xi32, #tpu.memory_space<smem>>
    %294 = arith.index_cast %293 : i32 to index
    %c0_174 = arith.constant 0 : index
    %295 = vector.load %arg2[%294, %c0_174] : memref<64x128xf32, #tpu.memory_space<vmem>>, vector<1x128xf32>
    %c6_175 = arith.constant 6 : index
    %c0_176 = arith.constant 0 : index
    %296 = vector.load %arg9[%c6_175, %c0_176] : memref<8x128xf32, #tpu.memory_space<vmem>>, vector<1x128xf32>
    tpu.vector_store %arg9[%c6_175, %c0_176], %295 {strides = array<i32>} : memref<8x128xf32, #tpu.memory_space<vmem>>, vector<1x128xf32>,
    %c7_177 = arith.constant 7 : index
    %297 = arith.index_cast %c4_i32 : i32 to index
    %298 = memref.load %arg0[%c7_177, %297] : memref<8x8xi32, #tpu.memory_space<smem>>
    %299 = arith.index_cast %298 : i32 to index
    %c0_178 = arith.constant 0 : index
    %300 = vector.load %arg2[%299, %c0_178] : memref<64x128xf32, #tpu.memory_space<vmem>>, vector<1x128xf32>
    %c7_179 = arith.constant 7 : index
    %c0_180 = arith.constant 0 : index
    %301 = vector.load %arg9[%c7_179, %c0_180] : memref<8x128xf32, #tpu.memory_space<vmem>>, vector<1x128xf32>
    tpu.vector_store %arg9[%c7_179, %c0_180], %300 {strides = array<i32>} : memref<8x128xf32, #tpu.memory_space<vmem>>, vector<1x128xf32>,
    %c0_181 = arith.constant 0 : index
    %c0_182 = arith.constant 0 : index
    %302 = vector.load %arg9[%c0_181, %c0_182] : memref<8x128xf32, #tpu.memory_space<vmem>>, vector<8x128xf32>
    %c0_183 = arith.constant 0 : index
    %c0_184 = arith.constant 0 : index
    %303 = vector.load %arg3[%c0_183, %c0_184] : memref<32x128xf32, #tpu.memory_space<vmem>>, vector<32x128xf32>
    %cst_185 = arith.constant dense<0.000000e+00> : vector<8x128xf32>
    %304 = tpu.matmul %256, %303, %cst_185 {dimension_numbers = #tpu.dot_dimension_numbers<[1], [0], [0], [1], [0, 0, 1, 1], [], []>} : vector<8x32xf32>, vector<32x128xf32>, vector<8x128xf32> -> vector<8x128xf32>
    %305 = arith.addf %302, %304 : vector<8x128xf32>
    %306 = arith.negf %305 : vector<8x128xf32>
    %307 = math.exp %306 : vector<8x128xf32>
    %cst_186 = arith.constant 1.000000e+00 : f32
    %308 = vector.broadcast %cst_186 : f32 to vector<8x128xf32>
    %309 = arith.addf %308, %307 : vector<8x128xf32>
    %310 = arith.divf %308, %309 : vector<8x128xf32>
    %311 = math.tanh %305 : vector<8x128xf32>
    %312 = vector.extract_strided_slice %310 {offsets = [0, 0], sizes = [8, 32], strides = [1, 1]} : vector<8x128xf32> to vector<8x32xf32>
    %313 = vector.extract_strided_slice %310 {offsets = [0, 32], sizes = [8, 32], strides = [1, 1]} : vector<8x128xf32> to vector<8x32xf32>
    %314 = vector.extract_strided_slice %311 {offsets = [0, 64], sizes = [8, 32], strides = [1, 1]} : vector<8x128xf32> to vector<8x32xf32>
    %315 = vector.extract_strided_slice %310 {offsets = [0, 96], sizes = [8, 32], strides = [1, 1]} : vector<8x128xf32> to vector<8x32xf32>
    %316 = arith.mulf %313, %254 : vector<8x32xf32>
    %317 = arith.mulf %312, %314 : vector<8x32xf32>
    %318 = arith.addf %316, %317 : vector<8x32xf32>
    %319 = math.tanh %318 : vector<8x32xf32>
    %320 = arith.mulf %315, %319 : vector<8x32xf32>
    %321 = vector.broadcast %c4_i32 : i32 to vector<8x1xi32>
    %322 = arith.cmpi eq, %2, %321 : vector<8x1xi32>
    %323 = vector.shape_cast %322 : vector<8x1xi1> to vector<8x1xi1>
    %324 = vector.broadcast %323 : vector<8x1xi1> to vector<8x32xi1>
    %325 = arith.select %324, %320, %261 : vector<8x32xi1>, vector<8x32xf32>
    %c5_i32 = arith.constant 5 : i32
    %c0_187 = arith.constant 0 : index
    %326 = arith.index_cast %c5_i32 : i32 to index
    %327 = memref.load %arg0[%c0_187, %326] : memref<8x8xi32, #tpu.memory_space<smem>>
    %328 = arith.index_cast %327 : i32 to index
    %c0_188 = arith.constant 0 : index
    %329 = vector.load %arg2[%328, %c0_188] : memref<64x128xf32, #tpu.memory_space<vmem>>, vector<1x128xf32>
    %c0_189 = arith.constant 0 : index
    %c0_190 = arith.constant 0 : index
    %330 = vector.load %arg9[%c0_189, %c0_190] : memref<8x128xf32, #tpu.memory_space<vmem>>, vector<1x128xf32>
    tpu.vector_store %arg9[%c0_189, %c0_190], %329 {strides = array<i32>} : memref<8x128xf32, #tpu.memory_space<vmem>>, vector<1x128xf32>,
    %c1_191 = arith.constant 1 : index
    %331 = arith.index_cast %c5_i32 : i32 to index
    %332 = memref.load %arg0[%c1_191, %331] : memref<8x8xi32, #tpu.memory_space<smem>>
    %333 = arith.index_cast %332 : i32 to index
    %c0_192 = arith.constant 0 : index
    %334 = vector.load %arg2[%333, %c0_192] : memref<64x128xf32, #tpu.memory_space<vmem>>, vector<1x128xf32>
    %c1_193 = arith.constant 1 : index
    %c0_194 = arith.constant 0 : index
    %335 = vector.load %arg9[%c1_193, %c0_194] : memref<8x128xf32, #tpu.memory_space<vmem>>, vector<1x128xf32>
    tpu.vector_store %arg9[%c1_193, %c0_194], %334 {strides = array<i32>} : memref<8x128xf32, #tpu.memory_space<vmem>>, vector<1x128xf32>,
    %c2_195 = arith.constant 2 : index
    %336 = arith.index_cast %c5_i32 : i32 to index
    %337 = memref.load %arg0[%c2_195, %336] : memref<8x8xi32, #tpu.memory_space<smem>>
    %338 = arith.index_cast %337 : i32 to index
    %c0_196 = arith.constant 0 : index
    %339 = vector.load %arg2[%338, %c0_196] : memref<64x128xf32, #tpu.memory_space<vmem>>, vector<1x128xf32>
    %c2_197 = arith.constant 2 : index
    %c0_198 = arith.constant 0 : index
    %340 = vector.load %arg9[%c2_197, %c0_198] : memref<8x128xf32, #tpu.memory_space<vmem>>, vector<1x128xf32>
    tpu.vector_store %arg9[%c2_197, %c0_198], %339 {strides = array<i32>} : memref<8x128xf32, #tpu.memory_space<vmem>>, vector<1x128xf32>,
    %c3_199 = arith.constant 3 : index
    %341 = arith.index_cast %c5_i32 : i32 to index
    %342 = memref.load %arg0[%c3_199, %341] : memref<8x8xi32, #tpu.memory_space<smem>>
    %343 = arith.index_cast %342 : i32 to index
    %c0_200 = arith.constant 0 : index
    %344 = vector.load %arg2[%343, %c0_200] : memref<64x128xf32, #tpu.memory_space<vmem>>, vector<1x128xf32>
    %c3_201 = arith.constant 3 : index
    %c0_202 = arith.constant 0 : index
    %345 = vector.load %arg9[%c3_201, %c0_202] : memref<8x128xf32, #tpu.memory_space<vmem>>, vector<1x128xf32>
    tpu.vector_store %arg9[%c3_201, %c0_202], %344 {strides = array<i32>} : memref<8x128xf32, #tpu.memory_space<vmem>>, vector<1x128xf32>,
    %c4_203 = arith.constant 4 : index
    %346 = arith.index_cast %c5_i32 : i32 to index
    %347 = memref.load %arg0[%c4_203, %346] : memref<8x8xi32, #tpu.memory_space<smem>>
    %348 = arith.index_cast %347 : i32 to index
    %c0_204 = arith.constant 0 : index
    %349 = vector.load %arg2[%348, %c0_204] : memref<64x128xf32, #tpu.memory_space<vmem>>, vector<1x128xf32>
    %c4_205 = arith.constant 4 : index
    %c0_206 = arith.constant 0 : index
    %350 = vector.load %arg9[%c4_205, %c0_206] : memref<8x128xf32, #tpu.memory_space<vmem>>, vector<1x128xf32>
    tpu.vector_store %arg9[%c4_205, %c0_206], %349 {strides = array<i32>} : memref<8x128xf32, #tpu.memory_space<vmem>>, vector<1x128xf32>,
    %c5_207 = arith.constant 5 : index
    %351 = arith.index_cast %c5_i32 : i32 to index
    %352 = memref.load %arg0[%c5_207, %351] : memref<8x8xi32, #tpu.memory_space<smem>>
    %353 = arith.index_cast %352 : i32 to index
    %c0_208 = arith.constant 0 : index
    %354 = vector.load %arg2[%353, %c0_208] : memref<64x128xf32, #tpu.memory_space<vmem>>, vector<1x128xf32>
    %c5_209 = arith.constant 5 : index
    %c0_210 = arith.constant 0 : index
    %355 = vector.load %arg9[%c5_209, %c0_210] : memref<8x128xf32, #tpu.memory_space<vmem>>, vector<1x128xf32>
    tpu.vector_store %arg9[%c5_209, %c0_210], %354 {strides = array<i32>} : memref<8x128xf32, #tpu.memory_space<vmem>>, vector<1x128xf32>,
    %c6_211 = arith.constant 6 : index
    %356 = arith.index_cast %c5_i32 : i32 to index
    %357 = memref.load %arg0[%c6_211, %356] : memref<8x8xi32, #tpu.memory_space<smem>>
    %358 = arith.index_cast %357 : i32 to index
    %c0_212 = arith.constant 0 : index
    %359 = vector.load %arg2[%358, %c0_212] : memref<64x128xf32, #tpu.memory_space<vmem>>, vector<1x128xf32>
    %c6_213 = arith.constant 6 : index
    %c0_214 = arith.constant 0 : index
    %360 = vector.load %arg9[%c6_213, %c0_214] : memref<8x128xf32, #tpu.memory_space<vmem>>, vector<1x128xf32>
    tpu.vector_store %arg9[%c6_213, %c0_214], %359 {strides = array<i32>} : memref<8x128xf32, #tpu.memory_space<vmem>>, vector<1x128xf32>,
    %c7_215 = arith.constant 7 : index
    %361 = arith.index_cast %c5_i32 : i32 to index
    %362 = memref.load %arg0[%c7_215, %361] : memref<8x8xi32, #tpu.memory_space<smem>>
    %363 = arith.index_cast %362 : i32 to index
    %c0_216 = arith.constant 0 : index
    %364 = vector.load %arg2[%363, %c0_216] : memref<64x128xf32, #tpu.memory_space<vmem>>, vector<1x128xf32>
    %c7_217 = arith.constant 7 : index
    %c0_218 = arith.constant 0 : index
    %365 = vector.load %arg9[%c7_217, %c0_218] : memref<8x128xf32, #tpu.memory_space<vmem>>, vector<1x128xf32>
    tpu.vector_store %arg9[%c7_217, %c0_218], %364 {strides = array<i32>} : memref<8x128xf32, #tpu.memory_space<vmem>>, vector<1x128xf32>,
    %c0_219 = arith.constant 0 : index
    %c0_220 = arith.constant 0 : index
    %366 = vector.load %arg9[%c0_219, %c0_220] : memref<8x128xf32, #tpu.memory_space<vmem>>, vector<8x128xf32>
    %c0_221 = arith.constant 0 : index
    %c0_222 = arith.constant 0 : index
    %367 = vector.load %arg3[%c0_221, %c0_222] : memref<32x128xf32, #tpu.memory_space<vmem>>, vector<32x128xf32>
    %cst_223 = arith.constant dense<0.000000e+00> : vector<8x128xf32>
    %368 = tpu.matmul %320, %367, %cst_223 {dimension_numbers = #tpu.dot_dimension_numbers<[1], [0], [0], [1], [0, 0, 1, 1], [], []>} : vector<8x32xf32>, vector<32x128xf32>, vector<8x128xf32> -> vector<8x128xf32>
    %369 = arith.addf %366, %368 : vector<8x128xf32>
    %370 = arith.negf %369 : vector<8x128xf32>
    %371 = math.exp %370 : vector<8x128xf32>
    %cst_224 = arith.constant 1.000000e+00 : f32
    %372 = vector.broadcast %cst_224 : f32 to vector<8x128xf32>
    %373 = arith.addf %372, %371 : vector<8x128xf32>
    %374 = arith.divf %372, %373 : vector<8x128xf32>
    %375 = math.tanh %369 : vector<8x128xf32>
    %376 = vector.extract_strided_slice %374 {offsets = [0, 0], sizes = [8, 32], strides = [1, 1]} : vector<8x128xf32> to vector<8x32xf32>
    %377 = vector.extract_strided_slice %374 {offsets = [0, 32], sizes = [8, 32], strides = [1, 1]} : vector<8x128xf32> to vector<8x32xf32>
    %378 = vector.extract_strided_slice %375 {offsets = [0, 64], sizes = [8, 32], strides = [1, 1]} : vector<8x128xf32> to vector<8x32xf32>
    %379 = vector.extract_strided_slice %374 {offsets = [0, 96], sizes = [8, 32], strides = [1, 1]} : vector<8x128xf32> to vector<8x32xf32>
    %380 = arith.mulf %377, %318 : vector<8x32xf32>
    %381 = arith.mulf %376, %378 : vector<8x32xf32>
    %382 = arith.addf %380, %381 : vector<8x32xf32>
    %383 = math.tanh %382 : vector<8x32xf32>
    %384 = arith.mulf %379, %383 : vector<8x32xf32>
    %385 = vector.broadcast %c5_i32 : i32 to vector<8x1xi32>
    %386 = arith.cmpi eq, %2, %385 : vector<8x1xi32>
    %387 = vector.shape_cast %386 : vector<8x1xi1> to vector<8x1xi1>
    %388 = vector.broadcast %387 : vector<8x1xi1> to vector<8x32xi1>
    %389 = arith.select %388, %384, %325 : vector<8x32xi1>, vector<8x32xf32>
    %c6_i32 = arith.constant 6 : i32
    %c0_225 = arith.constant 0 : index
    %390 = arith.index_cast %c6_i32 : i32 to index
    %391 = memref.load %arg0[%c0_225, %390] : memref<8x8xi32, #tpu.memory_space<smem>>
    %392 = arith.index_cast %391 : i32 to index
    %c0_226 = arith.constant 0 : index
    %393 = vector.load %arg2[%392, %c0_226] : memref<64x128xf32, #tpu.memory_space<vmem>>, vector<1x128xf32>
    %c0_227 = arith.constant 0 : index
    %c0_228 = arith.constant 0 : index
    %394 = vector.load %arg9[%c0_227, %c0_228] : memref<8x128xf32, #tpu.memory_space<vmem>>, vector<1x128xf32>
    tpu.vector_store %arg9[%c0_227, %c0_228], %393 {strides = array<i32>} : memref<8x128xf32, #tpu.memory_space<vmem>>, vector<1x128xf32>,
    %c1_229 = arith.constant 1 : index
    %395 = arith.index_cast %c6_i32 : i32 to index
    %396 = memref.load %arg0[%c1_229, %395] : memref<8x8xi32, #tpu.memory_space<smem>>
    %397 = arith.index_cast %396 : i32 to index
    %c0_230 = arith.constant 0 : index
    %398 = vector.load %arg2[%397, %c0_230] : memref<64x128xf32, #tpu.memory_space<vmem>>, vector<1x128xf32>
    %c1_231 = arith.constant 1 : index
    %c0_232 = arith.constant 0 : index
    %399 = vector.load %arg9[%c1_231, %c0_232] : memref<8x128xf32, #tpu.memory_space<vmem>>, vector<1x128xf32>
    tpu.vector_store %arg9[%c1_231, %c0_232], %398 {strides = array<i32>} : memref<8x128xf32, #tpu.memory_space<vmem>>, vector<1x128xf32>,
    %c2_233 = arith.constant 2 : index
    %400 = arith.index_cast %c6_i32 : i32 to index
    %401 = memref.load %arg0[%c2_233, %400] : memref<8x8xi32, #tpu.memory_space<smem>>
    %402 = arith.index_cast %401 : i32 to index
    %c0_234 = arith.constant 0 : index
    %403 = vector.load %arg2[%402, %c0_234] : memref<64x128xf32, #tpu.memory_space<vmem>>, vector<1x128xf32>
    %c2_235 = arith.constant 2 : index
    %c0_236 = arith.constant 0 : index
    %404 = vector.load %arg9[%c2_235, %c0_236] : memref<8x128xf32, #tpu.memory_space<vmem>>, vector<1x128xf32>
    tpu.vector_store %arg9[%c2_235, %c0_236], %403 {strides = array<i32>} : memref<8x128xf32, #tpu.memory_space<vmem>>, vector<1x128xf32>,
    %c3_237 = arith.constant 3 : index
    %405 = arith.index_cast %c6_i32 : i32 to index
    %406 = memref.load %arg0[%c3_237, %405] : memref<8x8xi32, #tpu.memory_space<smem>>
    %407 = arith.index_cast %406 : i32 to index
    %c0_238 = arith.constant 0 : index
    %408 = vector.load %arg2[%407, %c0_238] : memref<64x128xf32, #tpu.memory_space<vmem>>, vector<1x128xf32>
    %c3_239 = arith.constant 3 : index
    %c0_240 = arith.constant 0 : index
    %409 = vector.load %arg9[%c3_239, %c0_240] : memref<8x128xf32, #tpu.memory_space<vmem>>, vector<1x128xf32>
    tpu.vector_store %arg9[%c3_239, %c0_240], %408 {strides = array<i32>} : memref<8x128xf32, #tpu.memory_space<vmem>>, vector<1x128xf32>,
    %c4_241 = arith.constant 4 : index
    %410 = arith.index_cast %c6_i32 : i32 to index
    %411 = memref.load %arg0[%c4_241, %410] : memref<8x8xi32, #tpu.memory_space<smem>>
    %412 = arith.index_cast %411 : i32 to index
    %c0_242 = arith.constant 0 : index
    %413 = vector.load %arg2[%412, %c0_242] : memref<64x128xf32, #tpu.memory_space<vmem>>, vector<1x128xf32>
    %c4_243 = arith.constant 4 : index
    %c0_244 = arith.constant 0 : index
    %414 = vector.load %arg9[%c4_243, %c0_244] : memref<8x128xf32, #tpu.memory_space<vmem>>, vector<1x128xf32>
    tpu.vector_store %arg9[%c4_243, %c0_244], %413 {strides = array<i32>} : memref<8x128xf32, #tpu.memory_space<vmem>>, vector<1x128xf32>,
    %c5_245 = arith.constant 5 : index
    %415 = arith.index_cast %c6_i32 : i32 to index
    %416 = memref.load %arg0[%c5_245, %415] : memref<8x8xi32, #tpu.memory_space<smem>>
    %417 = arith.index_cast %416 : i32 to index
    %c0_246 = arith.constant 0 : index
    %418 = vector.load %arg2[%417, %c0_246] : memref<64x128xf32, #tpu.memory_space<vmem>>, vector<1x128xf32>
    %c5_247 = arith.constant 5 : index
    %c0_248 = arith.constant 0 : index
    %419 = vector.load %arg9[%c5_247, %c0_248] : memref<8x128xf32, #tpu.memory_space<vmem>>, vector<1x128xf32>
    tpu.vector_store %arg9[%c5_247, %c0_248], %418 {strides = array<i32>} : memref<8x128xf32, #tpu.memory_space<vmem>>, vector<1x128xf32>,
    %c6_249 = arith.constant 6 : index
    %420 = arith.index_cast %c6_i32 : i32 to index
    %421 = memref.load %arg0[%c6_249, %420] : memref<8x8xi32, #tpu.memory_space<smem>>
    %422 = arith.index_cast %421 : i32 to index
    %c0_250 = arith.constant 0 : index
    %423 = vector.load %arg2[%422, %c0_250] : memref<64x128xf32, #tpu.memory_space<vmem>>, vector<1x128xf32>
    %c6_251 = arith.constant 6 : index
    %c0_252 = arith.constant 0 : index
    %424 = vector.load %arg9[%c6_251, %c0_252] : memref<8x128xf32, #tpu.memory_space<vmem>>, vector<1x128xf32>
    tpu.vector_store %arg9[%c6_251, %c0_252], %423 {strides = array<i32>} : memref<8x128xf32, #tpu.memory_space<vmem>>, vector<1x128xf32>,
    %c7_253 = arith.constant 7 : index
    %425 = arith.index_cast %c6_i32 : i32 to index
    %426 = memref.load %arg0[%c7_253, %425] : memref<8x8xi32, #tpu.memory_space<smem>>
    %427 = arith.index_cast %426 : i32 to index
    %c0_254 = arith.constant 0 : index
    %428 = vector.load %arg2[%427, %c0_254] : memref<64x128xf32, #tpu.memory_space<vmem>>, vector<1x128xf32>
    %c7_255 = arith.constant 7 : index
    %c0_256 = arith.constant 0 : index
    %429 = vector.load %arg9[%c7_255, %c0_256] : memref<8x128xf32, #tpu.memory_space<vmem>>, vector<1x128xf32>
    tpu.vector_store %arg9[%c7_255, %c0_256], %428 {strides = array<i32>} : memref<8x128xf32, #tpu.memory_space<vmem>>, vector<1x128xf32>,
    %c0_257 = arith.constant 0 : index
    %c0_258 = arith.constant 0 : index
    %430 = vector.load %arg9[%c0_257, %c0_258] : memref<8x128xf32, #tpu.memory_space<vmem>>, vector<8x128xf32>
    %c0_259 = arith.constant 0 : index
    %c0_260 = arith.constant 0 : index
    %431 = vector.load %arg3[%c0_259, %c0_260] : memref<32x128xf32, #tpu.memory_space<vmem>>, vector<32x128xf32>
    %cst_261 = arith.constant dense<0.000000e+00> : vector<8x128xf32>
    %432 = tpu.matmul %384, %431, %cst_261 {dimension_numbers = #tpu.dot_dimension_numbers<[1], [0], [0], [1], [0, 0, 1, 1], [], []>} : vector<8x32xf32>, vector<32x128xf32>, vector<8x128xf32> -> vector<8x128xf32>
    %433 = arith.addf %430, %432 : vector<8x128xf32>
    %434 = arith.negf %433 : vector<8x128xf32>
    %435 = math.exp %434 : vector<8x128xf32>
    %cst_262 = arith.constant 1.000000e+00 : f32
    %436 = vector.broadcast %cst_262 : f32 to vector<8x128xf32>
    %437 = arith.addf %436, %435 : vector<8x128xf32>
    %438 = arith.divf %436, %437 : vector<8x128xf32>
    %439 = math.tanh %433 : vector<8x128xf32>
    %440 = vector.extract_strided_slice %438 {offsets = [0, 0], sizes = [8, 32], strides = [1, 1]} : vector<8x128xf32> to vector<8x32xf32>
    %441 = vector.extract_strided_slice %438 {offsets = [0, 32], sizes = [8, 32], strides = [1, 1]} : vector<8x128xf32> to vector<8x32xf32>
    %442 = vector.extract_strided_slice %439 {offsets = [0, 64], sizes = [8, 32], strides = [1, 1]} : vector<8x128xf32> to vector<8x32xf32>
    %443 = vector.extract_strided_slice %438 {offsets = [0, 96], sizes = [8, 32], strides = [1, 1]} : vector<8x128xf32> to vector<8x32xf32>
    %444 = arith.mulf %441, %382 : vector<8x32xf32>
    %445 = arith.mulf %440, %442 : vector<8x32xf32>
    %446 = arith.addf %444, %445 : vector<8x32xf32>
    %447 = math.tanh %446 : vector<8x32xf32>
    %448 = arith.mulf %443, %447 : vector<8x32xf32>
    %449 = vector.broadcast %c6_i32 : i32 to vector<8x1xi32>
    %450 = arith.cmpi eq, %2, %449 : vector<8x1xi32>
    %451 = vector.shape_cast %450 : vector<8x1xi1> to vector<8x1xi1>
    %452 = vector.broadcast %451 : vector<8x1xi1> to vector<8x32xi1>
    %453 = arith.select %452, %448, %389 : vector<8x32xi1>, vector<8x32xf32>
    %c7_i32 = arith.constant 7 : i32
    %c0_263 = arith.constant 0 : index
    %454 = arith.index_cast %c7_i32 : i32 to index
    %455 = memref.load %arg0[%c0_263, %454] : memref<8x8xi32, #tpu.memory_space<smem>>
    %456 = arith.index_cast %455 : i32 to index
    %c0_264 = arith.constant 0 : index
    %457 = vector.load %arg2[%456, %c0_264] : memref<64x128xf32, #tpu.memory_space<vmem>>, vector<1x128xf32>
    %c0_265 = arith.constant 0 : index
    %c0_266 = arith.constant 0 : index
    %458 = vector.load %arg9[%c0_265, %c0_266] : memref<8x128xf32, #tpu.memory_space<vmem>>, vector<1x128xf32>
    tpu.vector_store %arg9[%c0_265, %c0_266], %457 {strides = array<i32>} : memref<8x128xf32, #tpu.memory_space<vmem>>, vector<1x128xf32>,
    %c1_267 = arith.constant 1 : index
    %459 = arith.index_cast %c7_i32 : i32 to index
    %460 = memref.load %arg0[%c1_267, %459] : memref<8x8xi32, #tpu.memory_space<smem>>
    %461 = arith.index_cast %460 : i32 to index
    %c0_268 = arith.constant 0 : index
    %462 = vector.load %arg2[%461, %c0_268] : memref<64x128xf32, #tpu.memory_space<vmem>>, vector<1x128xf32>
    %c1_269 = arith.constant 1 : index
    %c0_270 = arith.constant 0 : index
    %463 = vector.load %arg9[%c1_269, %c0_270] : memref<8x128xf32, #tpu.memory_space<vmem>>, vector<1x128xf32>
    tpu.vector_store %arg9[%c1_269, %c0_270], %462 {strides = array<i32>} : memref<8x128xf32, #tpu.memory_space<vmem>>, vector<1x128xf32>,
    %c2_271 = arith.constant 2 : index
    %464 = arith.index_cast %c7_i32 : i32 to index
    %465 = memref.load %arg0[%c2_271, %464] : memref<8x8xi32, #tpu.memory_space<smem>>
    %466 = arith.index_cast %465 : i32 to index
    %c0_272 = arith.constant 0 : index
    %467 = vector.load %arg2[%466, %c0_272] : memref<64x128xf32, #tpu.memory_space<vmem>>, vector<1x128xf32>
    %c2_273 = arith.constant 2 : index
    %c0_274 = arith.constant 0 : index
    %468 = vector.load %arg9[%c2_273, %c0_274] : memref<8x128xf32, #tpu.memory_space<vmem>>, vector<1x128xf32>
    tpu.vector_store %arg9[%c2_273, %c0_274], %467 {strides = array<i32>} : memref<8x128xf32, #tpu.memory_space<vmem>>, vector<1x128xf32>,
    %c3_275 = arith.constant 3 : index
    %469 = arith.index_cast %c7_i32 : i32 to index
    %470 = memref.load %arg0[%c3_275, %469] : memref<8x8xi32, #tpu.memory_space<smem>>
    %471 = arith.index_cast %470 : i32 to index
    %c0_276 = arith.constant 0 : index
    %472 = vector.load %arg2[%471, %c0_276] : memref<64x128xf32, #tpu.memory_space<vmem>>, vector<1x128xf32>
    %c3_277 = arith.constant 3 : index
    %c0_278 = arith.constant 0 : index
    %473 = vector.load %arg9[%c3_277, %c0_278] : memref<8x128xf32, #tpu.memory_space<vmem>>, vector<1x128xf32>
    tpu.vector_store %arg9[%c3_277, %c0_278], %472 {strides = array<i32>} : memref<8x128xf32, #tpu.memory_space<vmem>>, vector<1x128xf32>,
    %c4_279 = arith.constant 4 : index
    %474 = arith.index_cast %c7_i32 : i32 to index
    %475 = memref.load %arg0[%c4_279, %474] : memref<8x8xi32, #tpu.memory_space<smem>>
    %476 = arith.index_cast %475 : i32 to index
    %c0_280 = arith.constant 0 : index
    %477 = vector.load %arg2[%476, %c0_280] : memref<64x128xf32, #tpu.memory_space<vmem>>, vector<1x128xf32>
    %c4_281 = arith.constant 4 : index
    %c0_282 = arith.constant 0 : index
    %478 = vector.load %arg9[%c4_281, %c0_282] : memref<8x128xf32, #tpu.memory_space<vmem>>, vector<1x128xf32>
    tpu.vector_store %arg9[%c4_281, %c0_282], %477 {strides = array<i32>} : memref<8x128xf32, #tpu.memory_space<vmem>>, vector<1x128xf32>,
    %c5_283 = arith.constant 5 : index
    %479 = arith.index_cast %c7_i32 : i32 to index
    %480 = memref.load %arg0[%c5_283, %479] : memref<8x8xi32, #tpu.memory_space<smem>>
    %481 = arith.index_cast %480 : i32 to index
    %c0_284 = arith.constant 0 : index
    %482 = vector.load %arg2[%481, %c0_284] : memref<64x128xf32, #tpu.memory_space<vmem>>, vector<1x128xf32>
    %c5_285 = arith.constant 5 : index
    %c0_286 = arith.constant 0 : index
    %483 = vector.load %arg9[%c5_285, %c0_286] : memref<8x128xf32, #tpu.memory_space<vmem>>, vector<1x128xf32>
    tpu.vector_store %arg9[%c5_285, %c0_286], %482 {strides = array<i32>} : memref<8x128xf32, #tpu.memory_space<vmem>>, vector<1x128xf32>,
    %c6_287 = arith.constant 6 : index
    %484 = arith.index_cast %c7_i32 : i32 to index
    %485 = memref.load %arg0[%c6_287, %484] : memref<8x8xi32, #tpu.memory_space<smem>>
    %486 = arith.index_cast %485 : i32 to index
    %c0_288 = arith.constant 0 : index
    %487 = vector.load %arg2[%486, %c0_288] : memref<64x128xf32, #tpu.memory_space<vmem>>, vector<1x128xf32>
    %c6_289 = arith.constant 6 : index
    %c0_290 = arith.constant 0 : index
    %488 = vector.load %arg9[%c6_289, %c0_290] : memref<8x128xf32, #tpu.memory_space<vmem>>, vector<1x128xf32>
    tpu.vector_store %arg9[%c6_289, %c0_290], %487 {strides = array<i32>} : memref<8x128xf32, #tpu.memory_space<vmem>>, vector<1x128xf32>,
    %c7_291 = arith.constant 7 : index
    %489 = arith.index_cast %c7_i32 : i32 to index
    %490 = memref.load %arg0[%c7_291, %489] : memref<8x8xi32, #tpu.memory_space<smem>>
    %491 = arith.index_cast %490 : i32 to index
    %c0_292 = arith.constant 0 : index
    %492 = vector.load %arg2[%491, %c0_292] : memref<64x128xf32, #tpu.memory_space<vmem>>, vector<1x128xf32>
    %c7_293 = arith.constant 7 : index
    %c0_294 = arith.constant 0 : index
    %493 = vector.load %arg9[%c7_293, %c0_294] : memref<8x128xf32, #tpu.memory_space<vmem>>, vector<1x128xf32>
    tpu.vector_store %arg9[%c7_293, %c0_294], %492 {strides = array<i32>} : memref<8x128xf32, #tpu.memory_space<vmem>>, vector<1x128xf32>,
    %c0_295 = arith.constant 0 : index
    %c0_296 = arith.constant 0 : index
    %494 = vector.load %arg9[%c0_295, %c0_296] : memref<8x128xf32, #tpu.memory_space<vmem>>, vector<8x128xf32>
    %c0_297 = arith.constant 0 : index
    %c0_298 = arith.constant 0 : index
    %495 = vector.load %arg3[%c0_297, %c0_298] : memref<32x128xf32, #tpu.memory_space<vmem>>, vector<32x128xf32>
    %cst_299 = arith.constant dense<0.000000e+00> : vector<8x128xf32>
    %496 = tpu.matmul %448, %495, %cst_299 {dimension_numbers = #tpu.dot_dimension_numbers<[1], [0], [0], [1], [0, 0, 1, 1], [], []>} : vector<8x32xf32>, vector<32x128xf32>, vector<8x128xf32> -> vector<8x128xf32>
    %497 = arith.addf %494, %496 : vector<8x128xf32>
    %498 = arith.negf %497 : vector<8x128xf32>
    %499 = math.exp %498 : vector<8x128xf32>
    %cst_300 = arith.constant 1.000000e+00 : f32
    %500 = vector.broadcast %cst_300 : f32 to vector<8x128xf32>
    %501 = arith.addf %500, %499 : vector<8x128xf32>
    %502 = arith.divf %500, %501 : vector<8x128xf32>
    %503 = math.tanh %497 : vector<8x128xf32>
    %504 = vector.extract_strided_slice %502 {offsets = [0, 0], sizes = [8, 32], strides = [1, 1]} : vector<8x128xf32> to vector<8x32xf32>
    %505 = vector.extract_strided_slice %502 {offsets = [0, 32], sizes = [8, 32], strides = [1, 1]} : vector<8x128xf32> to vector<8x32xf32>
    %506 = vector.extract_strided_slice %503 {offsets = [0, 64], sizes = [8, 32], strides = [1, 1]} : vector<8x128xf32> to vector<8x32xf32>
    %507 = vector.extract_strided_slice %502 {offsets = [0, 96], sizes = [8, 32], strides = [1, 1]} : vector<8x128xf32> to vector<8x32xf32>
    %508 = arith.mulf %505, %446 : vector<8x32xf32>
    %509 = arith.mulf %504, %506 : vector<8x32xf32>
    %510 = arith.addf %508, %509 : vector<8x32xf32>
    %511 = math.tanh %510 : vector<8x32xf32>
    %512 = arith.mulf %507, %511 : vector<8x32xf32>
    %513 = vector.broadcast %c7_i32 : i32 to vector<8x1xi32>
    %514 = arith.cmpi eq, %2, %513 : vector<8x1xi32>
    %515 = vector.shape_cast %514 : vector<8x1xi1> to vector<8x1xi1>
    %516 = vector.broadcast %515 : vector<8x1xi1> to vector<8x32xi1>
    %517 = arith.select %516, %512, %453 : vector<8x32xi1>, vector<8x32xf32>
    %c8_i32 = arith.constant 8 : i32
    %c0_301 = arith.constant 0 : index
    %c0_302 = arith.constant 0 : index
    %518 = vector.load %arg4[%c0_301, %c0_302] : memref<32x256xf32, #tpu.memory_space<vmem>>, vector<32x256xf32>
    %cst_303 = arith.constant dense<0.000000e+00> : vector<8x256xf32>
    %519 = tpu.matmul %517, %518, %cst_303 {dimension_numbers = #tpu.dot_dimension_numbers<[1], [0], [0], [1], [0, 0, 1, 1], [], []>} : vector<8x32xf32>, vector<32x256xf32>, vector<8x256xf32> -> vector<8x256xf32>
    %c0_304 = arith.constant 0 : index
    %c0_305 = arith.constant 0 : index
    %520 = vector.load %arg5[%c0_304, %c0_305] : memref<1x256xf32, #tpu.memory_space<vmem>>, vector<1x256xf32>
    %521 = vector.broadcast %520 : vector<1x256xf32> to vector<8x256xf32>
    %522 = arith.addf %519, %521 : vector<8x256xf32>
    %cst_306 = arith.constant 0.000000e+00 : f32
    %523 = vector.broadcast %cst_306 : f32 to vector<8x256xf32>
    %524 = arith.maximumf %522, %523 : vector<8x256xf32>
    %c0_307 = arith.constant 0 : index
    %c0_308 = arith.constant 0 : index
    %525 = vector.load %arg6[%c0_307, %c0_308] : memref<256x128xf32, #tpu.memory_space<vmem>>, vector<256x128xf32>
    %cst_309 = arith.constant dense<0.000000e+00> : vector<8x128xf32>
    %526 = tpu.matmul %524, %525, %cst_309 {dimension_numbers = #tpu.dot_dimension_numbers<[1], [0], [0], [1], [0, 0, 1, 1], [], []>} : vector<8x256xf32>, vector<256x128xf32>, vector<8x128xf32> -> vector<8x128xf32>
    %c0_310 = arith.constant 0 : index
    %c0_311 = arith.constant 0 : index
    %527 = vector.load %arg7[%c0_310, %c0_311] : memref<1x128xf32, #tpu.memory_space<vmem>>, vector<1x128xf32>
    %528 = vector.broadcast %527 : vector<1x128xf32> to vector<8x128xf32>
    %529 = arith.addf %526, %528 : vector<8x128xf32>
    %c0_312 = arith.constant 0 : index
    %c0_313 = arith.constant 0 : index
    %530 = vector.load %arg8[%c0_312, %c0_313] : memref<8x128xf32, #tpu.memory_space<vmem>>, vector<8x128xf32>
    tpu.vector_store %arg8[%c0_312, %c0_313], %529 {strides = array<i32>} : memref<8x128xf32, #tpu.memory_space<vmem>>, vector<8x128xf32>,
    return
  }
}

</mosaic_0001>

<bundles_post_ra>
// kernel: tpu_custom_call.1
= control target key start
LH: loop header
LB: loop body
LE: loop exit
PB: predicated region body
PF: predicated region fallthrough
CT: control target
= control target key end

     0   :  { %13 = vsyncpa [#allocation6], 0  ;;  %s2286_s0 = inlined_call_operand.vmem [shape: s32[8,8], index: 0, kind: input, shape index: {}]   ;;  %s2287_s1 = inlined_call_operand.vmem [shape: s32[8,1], index: 1, kind: input, shape index: {}]   ;;  %s2288_s2 = inlined_call_operand.hbm [shape: f32[64,128], index: 2, kind: input, shape index: {}]   ;;  %s2289_s3 = inlined_call_operand.hbm [shape: f32[32,128], index: 3, kind: input, shape index: {}]   ;;  %s2290_s4 = inlined_call_operand.hbm [shape: f32[32,256], index: 4, kind: input, shape index: {}]   ;;  %s2291_s5 = inlined_call_operand.vmem [shape: f32[1,256], index: 5, kind: input, shape index: {}]   ;;  %s2292_s6 = inlined_call_operand.hbm [shape: f32[256,128], index: 6, kind: input, shape index: {}]   ;;  %s2293_s7 = inlined_call_operand.vmem [shape: f32[1,128], index: 7, kind: input, shape index: {}]   ;;  %s2294_s8 = inlined_call_operand.hbm [shape: f32[8,128], index: 8, kind: output, shape index: {}]  }
   0x1   :  { %14 = vsyncpa [#allocation4], 0 }
   0x2   :  { %15 = vsyncpa [#allocation9], 0 }
   0x3   :  { %16 = vsyncpa [#allocation12], 0 }
   0x4   :  { %17 = vsyncpa [#allocation5], 0  ;;  %s24_s29 = sshll.u32 %s2286_s0, 4  ;;  %s1988_s30 = smov [#allocation8]   ;;  %s25_s29 = int_to_ptr.vmem [resolvable:$true] %s24_s29 }
   0x5   :  { %s47_s9 = sshll.u32 %s1988_s30, 4  ;;  %s48_s9 = int_to_ptr.vmem [resolvable:$true] %s47_s9 }
   0x6   :  { %s1874_s10 = scalar_lea.vmem %s48_s9, 512  ;;  %p1879_p1 = scmp.lt.s32.totalorder %s48_s9, %s48_s9 }
   0x7   :  { %p1875_p0 = scmp.ne.s32.totalorder %s48_s9, %s1874_s10  ;;  %p1880_p2 = scmp.lt.s32.totalorder %s1874_s10, %s1874_s10 }
   0x9   :  { %p1881_p3 = por %p1880_p2, %p1879_p1 }
   0xb   :  { %p1882_p4 = pnand %p1881_p3, %p1875_p0 }
   0xd   :  { %1885 = shalt.err (!%p1882_p4)
}
   0xe   :  { %s1989_s11 = smov 128   ;;  %s1990_s12 = smov 8  }
   0xf   :  { %53 = dma.hbm_to_vmem [thread:$0]  %s2289_s3, 512, %s48_s9, [#allocation9], %s1989_s11, %s1989_s11, %s1990_s12  }
  0x10   :  { %s1886_s0 = scalar_lea.vmem %s25_s29, 128  ;;  %p1891_p6 = scmp.lt.s32.totalorder %s25_s29, %s25_s29 }
  0x11   :  { %p1887_p5 = scmp.ne.s32.totalorder %s25_s29, %s1886_s0  ;;  %p1892_p7 = scmp.lt.s32.totalorder %s1886_s0, %s1886_s0 }
  0x13   :  { %p1893_p8 = por %p1892_p7, %p1891_p6 }
  0x15   :  { %p1894_p9 = pnand %p1893_p8, %p1887_p5 }
  0x17   :  { %1897 = shalt.err (!%p1894_p9)
}
  0x18   :  { %s1991_s15 = smov [#allocation3]   ;;  %s1992_s16 = smov [#allocation7]  }
  0x19   :  { %27 = dma.vmem_to_smem %s25_s29, 128, %s1991_s15, [#allocation6]  }
  0x1a   :  { %s35_s17 = sshll.u32 %s1992_s16, 4  ;;  %s1993_s18 = smov [#allocation10]   ;;  %s36_s17 = int_to_ptr.vmem [resolvable:$true] %s35_s17 }
  0x1b   :  { %s59_s19 = sshll.u32 %s1993_s18, 4  ;;  %s1906_s20 = scalar_lea.vmem %s36_s17, 1024  ;;  %s60_s19 = int_to_ptr.vmem [resolvable:$true] %s59_s19 }
  0x1c   :  { %p1907_p10 = scmp.ne.s32.totalorder %s36_s17, %s1906_s20  ;;  %p1911_p11 = scmp.lt.s32.totalorder %s36_s17, %s36_s17 }
  0x1d   :  { %p1912_p12 = scmp.lt.s32.totalorder %s1906_s20, %s1906_s20 }
  0x1f   :  { %p1913_p13 = por %p1912_p12, %p1911_p11 }
  0x21   :  { %p1914_p0 = pnand %p1913_p13, %p1907_p10 }
  0x23   :  { %1917 = shalt.err (!%p1914_p0)
}
  0x24   :  { %41 = dma.hbm_to_vmem [thread:$0]  %s2288_s2, 1024, %s36_s17, [#allocation4], %s1989_s11, %s1989_s11, %s1990_s12  }
  0x25   :  { %s1926_s22 = scalar_lea.vmem %s60_s19, 1024  ;;  %p1931_p2 = scmp.lt.s32.totalorder %s60_s19, %s60_s19 }
  0x26   :  { %p1927_p1 = scmp.ne.s32.totalorder %s60_s19, %s1926_s22  ;;  %p1932_p3 = scmp.lt.s32.totalorder %s1926_s22, %s1926_s22 }
  0x28   :  { %p1933_p4 = por %p1932_p3, %p1931_p2 }
  0x2a   :  { %p1934_p5 = pnand %p1933_p4, %p1927_p1 }
  0x2c   :  { %1937 = shalt.err (!%p1934_p5)
}
  0x2d   :  { %s1994_s23 = smov 256   ;;  %s1995_s24 = smov 16  }
  0x2e   :  { %65 = dma.hbm_to_vmem [thread:$0]  %s2290_s4, 1024, %s60_s19, [#allocation9], %s1994_s23, %s1994_s23, %s1995_s24  }
  0x2f   :  { %s1996_s27 = smov [#allocation11]  }
  0x30   :  { %s73_s28 = sshll.u32 %s1996_s27, 4  ;;  %s74_s28 = int_to_ptr.vmem [resolvable:$true] %s73_s28 }
  0x31   :  { %s1946_s29 = scalar_lea.vmem %s74_s28, 4096  ;;  %p1951_p7 = scmp.lt.s32.totalorder %s74_s28, %s74_s28 }
  0x32   :  { %p1947_p6 = scmp.ne.s32.totalorder %s74_s28, %s1946_s29  ;;  %p1952_p8 = scmp.lt.s32.totalorder %s1946_s29, %s1946_s29 }
  0x34   :  { %p1953_p9 = por %p1952_p8, %p1951_p7 }
  0x36   :  { %p1954_p10 = pnand %p1953_p9, %p1947_p6 }
  0x38   :  { %1957 = shalt.err (!%p1954_p10)
}
  0x39   :  { %79 = dma.hbm_to_vmem [thread:$0]  %s2292_s6, 4096, %s74_s28, [#allocation12], %s1989_s11, %s1989_s11, %s1990_s12  }
  0x3a   :  { %1978 = dma.done.wait [#allocation6], 128  }
  0x3b   :  { %1979 = vsyncadd [#allocation6], 4294967168 }
  0x3c   :  { %1980 = dma.done.wait [#allocation4], 1024  }
  0x3d   :  { %1981 = vsyncadd [#allocation4], 4294966272 }
  0x3e   :  { %1982 = dma.done.wait [#allocation9], 1536  }
  0x3f   :  { %1983 = vsyncadd [#allocation9], 4294965760 }
  0x40   :  { %1984 = dma.done.wait [#allocation12], 4096  }
  0x41   :  { %1985 = vsyncadd [#allocation12], 4294963200 }
  0x42   :  { %97 = sfence }
  0x43   :  { %v2072_v0 = vld [vmem:[#allocation8 + $0x18] sm:$0xff]  ;;  %v1997_v1 = vmov 0.0   ;;  %v2075_v2 = vld [vmem:[#allocation8 + $0x10] sm:$0xff]  ;;  %vm1998_vm0 = vmmov 0   ;;  %s100_s4 = sld [smem:[#allocation3]]  ;;  %v2082_v3 = vld [vmem:[#allocation8 + $0x8] sm:$0xff] }
  0x44   :  { %1697 = vmatprep.subr.mxu0 %v1997_v1  ;;  %1705 = vmatprep.mubr.msk.f32.mxu0 %vm1998_vm0, %v1997_v1  ;;  %s1542_s6 = sld [smem:[#allocation3 + $0x80]]  ;;  %v2090_v4 = vld [vmem:[#allocation8] sm:$0xff]  ;;  %s1999_s21 = smov 64   ;;  %vm137_vm1 = vcmask 261120  }
  0x45   :  { %1698 = vmatpush3.msra.mxu0 %v2072_v0  ;;  %1730 = vmatprep.subr.mxu1 %v1997_v1  ;;  %s1543_s9 = sld [smem:[#allocation3 + $0x100]]  ;;  %s2000_s22 = smov 32  }
  0x46   :  { %1699 = vmatprep.subr.mxu0 %v1997_v1  ;;  %1731 = vmatpush3.msra.mxu1 %v2072_v0  ;;  %s2086_s10 = sld [smem:[#allocation3 + $0x180]] }
  0x47   :  { %1700 = vmatpush3.msra.mxu0 %v2075_v2  ;;  %1732 = vmatprep.subr.mxu1 %v1997_v1  ;;  %s2092_s11 = sld [smem:[#allocation3 + $0x200]] }
  0x48   :  { %1701 = vmatprep.subr.mxu0 %v1997_v1  ;;  %1733 = vmatpush3.msra.mxu1 %v2075_v2  ;;  %s2096_s12 = sld [smem:[#allocation3 + $0x280]] }
  0x49   :  { %1702 = vmatpush3.msra.mxu0 %v2082_v3  ;;  %1734 = vmatprep.subr.mxu1 %v1997_v1  ;;  %s2100_s13 = sld [smem:[#allocation3 + $0x300]]  ;;  %s101_s14 = scalar_lea.vmem [#allocation7], %s100_s4 }
  0x4a   :  { %1703 = vmatprep.subr.mxu0 %v1997_v1  ;;  %1735 = vmatpush3.msra.mxu1 %v2082_v3  ;;  %v102_v5 = vld [vmem:[%s101_s14] sm:$0x1]  ;;  %s2104_s0 = sld [smem:[#allocation3 + $0x380]]  ;;  %s105_s15 = scalar_lea.vmem [#allocation7], %s1542_s6 }
  0x4b   :  { %1704 = vmatpush3.msra.mxu0 %v2090_v4  ;;  %1736 = vmatprep.subr.mxu1 %v1997_v1  ;;  %103 = vst [vmem:[#allocation2] sm:$0x1] %v102_v5  ;;  %v106_v6 = vld [vmem:[%s105_s15] sm:$0x1]  ;;  %s109_s16 = scalar_lea.vmem [#allocation7], %s1543_s9  ;;  %s1550_s23 = sld [smem:[#allocation3 + $0x1]] }
  0x4c   :  { %1706 = vmatmul.mubr.f32.vlgmr.msra.gmra.mxu0 %v1997_v1  ;;  %1708 = vmatprep.subr.mxu0 %v1997_v1  ;;  %107 = vst [vmem:[#allocation2 + $0x1] sm:$0x1] %v106_v6  ;;  %v110_v7 = vld [vmem:[%s109_s16] sm:$0x1]  ;;  %s113_s17 = scalar_lea.vmem [#allocation7], %s2086_s10  ;;  %s1551_s24 = sld [smem:[#allocation3 + $0x81]] }
  0x4d   :  { %1709 = vmatpush3.msra.mxu0 %v2072_v0  ;;  %1716 = vmatprep.mubr.msk.f32.mxu0 %vm1998_vm0, %v1997_v1  ;;  %111 = vst [vmem:[#allocation2 + $0x2] sm:$0x1] %v110_v7  ;;  %v114_v8 = vld [vmem:[%s113_s17] sm:$0x1]  ;;  %s117_s18 = scalar_lea.vmem [#allocation7], %s2092_s11  ;;  %s1552_s25 = sld [smem:[#allocation3 + $0x101]] }
  0x4e   :  { %1710 = vmatprep.subr.mxu0 %v1997_v1  ;;  %1737 = vmatpush3.msra.mxu1 %v2090_v4  ;;  %115 = vst [vmem:[#allocation2 + $0x3] sm:$0x1] %v114_v8  ;;  %v118_v9 = vld [vmem:[%s117_s18] sm:$0x1]  ;;  %s121_s19 = scalar_lea.vmem [#allocation7], %s2096_s12  ;;  %s1553_s26 = sld [smem:[#allocation3 + $0x181]] }
  0x4f   :  { %1711 = vmatpush3.msra.mxu0 %v2075_v2  ;;  %1738 = vmatprep.mubr.msk.f32.mxu1 %vm1998_vm0, %v1997_v1  ;;  %119 = vst [vmem:[#allocation2 + $0x4] sm:$0x1] %v118_v9  ;;  %v122_v10 = vld [vmem:[%s121_s19] sm:$0x1]  ;;  %s125_s20 = scalar_lea.vmem [#allocation7], %s2100_s13  ;;  %s1554_s27 = sld [smem:[#allocation3 + $0x201]] }
  0x50   :  { %1712 = vmatprep.subr.mxu0 %v1997_v1  ;;  %1752 = vmatprep.subr.mxu1 %v1997_v1  ;;  %123 = vst [vmem:[#allocation2 + $0x5] sm:$0x1] %v122_v10  ;;  %v126_v11 = vld [vmem:[%s125_s20] sm:$0x1]  ;;  %s129_s3 = scalar_lea.vmem [#allocation7], %s2104_s0  ;;  %s1555_s28 = sld [smem:[#allocation3 + $0x281]] }
  0x51   :  { %1713 = vmatpush3.msra.mxu0 %v2082_v3  ;;  %127 = vst [vmem:[#allocation2 + $0x6] sm:$0x1] %v126_v11  ;;  %v130_v12 = vld [vmem:[%s129_s3] sm:$0x1]  ;;  %s1556_s29 = sld [smem:[#allocation3 + $0x301]]  ;;  %s244_s2 = scalar_lea.vmem [#allocation7], %s1550_s23 }
  0x52   :  { %1714 = vmatprep.subr.mxu0 %v1997_v1  ;;  %131 = vst [vmem:[#allocation2 + $0x7] sm:$0x1] %v130_v12  ;;  %v245_v28 = vld [vmem:[%s244_s2] sm:$0x1]  ;;  %s1557_s30 = sld [smem:[#allocation3 + $0x381]]  ;;  %s248_s4 = scalar_lea.vmem [#allocation7], %s1551_s24 }
  0x53   :  { %1715 = vmatpush3.msra.mxu0 %v2090_v4  ;;  %v249_v29 = vld [vmem:[%s248_s4] sm:$0x1]  ;;  %s252_s6 = scalar_lea.vmem [#allocation7], %s1552_s25  ;;  %s1560_s14 = sld [smem:[#allocation3 + $0x2]] }
  0x54   :  { %1719 = vmatprep.subr.mxu0 %v1997_v1  ;;  %v253_v30 = vld [vmem:[%s252_s6] sm:$0x1]  ;;  %s256_s9 = scalar_lea.vmem [#allocation7], %s1553_s26  ;;  %s1561_s0 = sld [smem:[#allocation3 + $0x82]] }
  0x55   :  { %v257_v32 = vld [vmem:[%s256_s9] sm:$0x1]  ;;  %s260_s10 = scalar_lea.vmem [#allocation7], %s1554_s27  ;;  %s1562_s15 = sld [smem:[#allocation3 + $0x102]] }
  0x56   :  { %v261_v34 = vld [vmem:[%s260_s10] sm:$0x1]  ;;  %s264_s11 = scalar_lea.vmem [#allocation7], %s1555_s28  ;;  %s1563_s16 = sld [smem:[#allocation3 + $0x182]] }
  0x57   :  { %v265_v35 = vld [vmem:[%s264_s11] sm:$0x1]  ;;  %s268_s12 = scalar_lea.vmem [#allocation7], %s1556_s29  ;;  %s1564_s17 = sld [smem:[#allocation3 + $0x202]] }
  0x58   :  { %v269_v36 = vld [vmem:[%s268_s12] sm:$0x1]  ;;  %s272_s13 = scalar_lea.vmem [#allocation7], %s1557_s30  ;;  %s1565_s18 = sld [smem:[#allocation3 + $0x282]] }
  0x59   :  { %v132_v13 = vld [vmem:[#allocation2] sm:$0xff]  ;;  %s1566_s19 = sld [smem:[#allocation3 + $0x302]]  ;;  %s388_s20 = scalar_lea.vmem [#allocation7], %s1560_s14 }
  0x5a   :  { %246 = vst [vmem:[#allocation2] sm:$0x1] %v245_v28  ;;  %250 = vst [vmem:[#allocation2 + $0x1] sm:$0x1] %v249_v29  ;;  %v273_v37 = vld [vmem:[%s272_s13] sm:$0x1] }
  0x5b   :  { %254 = vst [vmem:[#allocation2 + $0x2] sm:$0x1] %v253_v30  ;;  %258 = vst [vmem:[#allocation2 + $0x3] sm:$0x1] %v257_v32  ;;  %v389_v54 = vld [vmem:[%s388_s20] sm:$0x1] }
  0x5c   :  { %262 = vst [vmem:[#allocation2 + $0x4] sm:$0x1] %v261_v34  ;;  %266 = vst [vmem:[#allocation2 + $0x5] sm:$0x1] %v265_v35  ;;  %s1567_s3 = sld [smem:[#allocation3 + $0x382]]  ;;  %s392_s23 = scalar_lea.vmem [#allocation7], %s1561_s0 }
  0x5d   :  { %270 = vst [vmem:[#allocation2 + $0x6] sm:$0x1] %v269_v36  ;;  %274 = vst [vmem:[#allocation2 + $0x7] sm:$0x1] %v273_v37  ;;  %v393_v55 = vld [vmem:[%s392_s23] sm:$0x1] }
  0x5e   :  { %s396_s24 = scalar_lea.vmem [#allocation7], %s1562_s15  ;;  %s400_s25 = scalar_lea.vmem [#allocation7], %s1563_s16 }
  0x5f   :  { %v397_v56 = vld [vmem:[%s396_s24] sm:$0x1]  ;;  %s404_s26 = scalar_lea.vmem [#allocation7], %s1564_s17  ;;  %s408_s27 = scalar_lea.vmem [#allocation7], %s1565_s18 }
  0x60   :  { %v401_v58 = vld [vmem:[%s400_s25] sm:$0x1]  ;;  %s412_s28 = scalar_lea.vmem [#allocation7], %s1566_s19  ;;  %s1570_s2 = sld [smem:[#allocation3 + $0x3]] }
  0x61   :  { %v405_v60 = vld [vmem:[%s404_s26] sm:$0x1]  ;;  %s1571_s30 = sld [smem:[#allocation3 + $0x83]] }
  0x62   :  { %v409_v61 = vld [vmem:[%s408_s27] sm:$0x1]  ;;  %s416_s29 = scalar_lea.vmem [#allocation7], %s1567_s3  ;;  %s1572_s4 = sld [smem:[#allocation3 + $0x103]] }
  0x63   :  { %v413_v62 = vld [vmem:[%s412_s28] sm:$0x1]  ;;  %s1573_s6 = sld [smem:[#allocation3 + $0x183]] }
  0x64   :  { %v275_v39 = vld [vmem:[#allocation2] sm:$0xff]  ;;  %s1574_s9 = sld [smem:[#allocation3 + $0x203]] }
  0x65   :  { %390 = vst [vmem:[#allocation2] sm:$0x1] %v389_v54  ;;  %394 = vst [vmem:[#allocation2 + $0x1] sm:$0x1] %v393_v55  ;;  %v417_v63 = vld [vmem:[%s416_s29] sm:$0x1] }
  0x66   :  { %398 = vst [vmem:[#allocation2 + $0x2] sm:$0x1] %v397_v56  ;;  %402 = vst [vmem:[#allocation2 + $0x3] sm:$0x1] %v401_v58  ;;  %s1575_s10 = sld [smem:[#allocation3 + $0x283]]  ;;  %s532_s12 = scalar_lea.vmem [#allocation7], %s1570_s2 }
  0x67   :  { %406 = vst [vmem:[#allocation2 + $0x4] sm:$0x1] %v405_v60  ;;  %410 = vst [vmem:[#allocation2 + $0x5] sm:$0x1] %v409_v61  ;;  %s1576_s11 = sld [smem:[#allocation3 + $0x303]]  ;;  %s536_s14 = scalar_lea.vmem [#allocation7], %s1571_s30 }
  0x68   :  { %414 = vst [vmem:[#allocation2 + $0x6] sm:$0x1] %v413_v62  ;;  %418 = vst [vmem:[#allocation2 + $0x7] sm:$0x1] %v417_v63  ;;  %s1577_s13 = sld [smem:[#allocation3 + $0x383]]  ;;  %s540_s0 = scalar_lea.vmem [#allocation7], %s1572_s4 }
  0x69   :  { %s544_s15 = scalar_lea.vmem [#allocation7], %s1573_s6  ;;  %s1580_s20 = sld [smem:[#allocation3 + $0x4]] }
  0x6a   :  { %s548_s16 = scalar_lea.vmem [#allocation7], %s1574_s9  ;;  %s1581_s3 = sld [smem:[#allocation3 + $0x84]] }
  0x6b   :  { %s1582_s23 = sld [smem:[#allocation3 + $0x104]] }
  0x6c   :  { %s552_s17 = scalar_lea.vmem [#allocation7], %s1575_s10  ;;  %s1583_s24 = sld [smem:[#allocation3 + $0x184]] }
  0x6d   :  { %v553_v28 = vld [vmem:[%s552_s17] sm:$0x1]  ;;  %s556_s18 = scalar_lea.vmem [#allocation7], %s1576_s11  ;;  %s1584_s25 = sld [smem:[#allocation3 + $0x204]] }
  0x6e   :  { %v557_v29 = vld [vmem:[%s556_s18] sm:$0x1]  ;;  %s560_s19 = scalar_lea.vmem [#allocation7], %s1577_s13  ;;  %s1585_s26 = sld [smem:[#allocation3 + $0x284]] }
  0x6f   :  { %v419_v6 = vld [vmem:[#allocation2] sm:$0xff]  ;;  %s1586_s27 = sld [smem:[#allocation3 + $0x304]]  ;;  %s676_s28 = scalar_lea.vmem [#allocation7], %s1580_s20 }
  0x70   :  { %554 = vst [vmem:[#allocation2 + $0x5] sm:$0x1] %v553_v28  ;;  %558 = vst [vmem:[#allocation2 + $0x6] sm:$0x1] %v557_v29  ;;  %v561_v30 = vld [vmem:[%s560_s19] sm:$0x1] }
  0x71   :  { %562 = vst [vmem:[#allocation2 + $0x7] sm:$0x1] %v561_v30  ;;  %s1587_s29 = sld [smem:[#allocation3 + $0x384]]  ;;  %s680_s2 = scalar_lea.vmem [#allocation7], %s1581_s3 }
  0x72   :  { %s684_s30 = scalar_lea.vmem [#allocation7], %s1582_s23  ;;  %s688_s4 = scalar_lea.vmem [#allocation7], %s1583_s24 }
  0x73   :  { %s692_s6 = scalar_lea.vmem [#allocation7], %s1584_s25  ;;  %s1591_s13 = sld [smem:[#allocation3 + $0x85]] }
  0x74   :  { %v693_v54 = vld [vmem:[%s692_s6] sm:$0x1]  ;;  %s696_s9 = scalar_lea.vmem [#allocation7], %s1585_s26  ;;  %s1596_s17 = sld [smem:[#allocation3 + $0x305]] }
  0x75   :  { %v697_v55 = vld [vmem:[%s696_s9] sm:$0x1]  ;;  %s700_s10 = scalar_lea.vmem [#allocation7], %s1586_s27  ;;  %s1597_s19 = sld [smem:[#allocation3 + $0x385]] }
  0x76   :  { %v701_v56 = vld [vmem:[%s700_s10] sm:$0x1]  ;;  %s1605_s6 = sld [smem:[#allocation3 + $0x286]] }
  0x77   :  { %s704_s11 = scalar_lea.vmem [#allocation7], %s1587_s29  ;;  %s1601_s29 = sld [smem:[#allocation3 + $0x86]] }
  0x78   :  { %s1606_s9 = sld [smem:[#allocation3 + $0x306]] }
  0x79   :  { %s824_s20 = scalar_lea.vmem [#allocation7], %s1591_s13 }
  0x7a   :  { %s844_s26 = scalar_lea.vmem [#allocation7], %s1596_s17 }
  0x7b   :  { %s848_s27 = scalar_lea.vmem [#allocation7], %s1597_s19  ;;  %s1611_s19 = sld [smem:[#allocation3 + $0x87]] }
 0x10c   :  { %v207_v14 = vpop.f32.mrf.mxu0 }
 0x10d   :  { %v211_v15 = vadd.f32 %v207_v14, %v132_v13 }
 0x10e   :  { %v1707_v16 = vpop.f32.mrf.mxu0 }
 0x10f   :  { %1802 = vtanh.f32 %v211_v15  ;;  %v1549_v18 = vmul.f32 -1.442695, %v211_v15 }
 0x111   :  { %1804 = vpow2.f32 %v1549_v18 }
 0x11c   :  { %v1803_v17 = vpop.eup %1802 }
 0x11d   :  { %221 = vrot.lane.b32.xlu0 %v1803_v17, %s1999_s21 }
 0x11e   :  { %v1805_v19 = vpop.eup %1804 }
 0x11f   :  { %v215_v20 = vadd.f32 1.0, %v1805_v19 }
 0x121   :  { %1806 = vrcp.f32 %v215_v20 }
 0x12e   :  { %v1807_v21 = vpop.eup %1806 }
 0x12f   :  { %v219_v24 = vmul.f32 0.0, %v1807_v21 }
 0x18f   :  { %v222_v22 = vpop.permute.xlu0 %221 }
 0x190   :  { %v224_v23 = vmul.f32 %v1807_v21, %v222_v22  ;;  %v537_v22 = vld [vmem:[%s536_s14] sm:$0x1]  ;;  %s1592_s14 = sld [smem:[#allocation3 + $0x105]] }
 0x191   :  { %538 = vst [vmem:[#allocation2 + $0x1] sm:$0x1] %v537_v22 }
 0x192   :  { %226 = vrot.lane.b32.xlu0 %v224_v23, %s2000_s22  ;;  %v541_v23 = vld [vmem:[%s540_s0] sm:$0x1]  ;;  %s1593_s0 = sld [smem:[#allocation3 + $0x185]] }
 0x193   :  { %542 = vst [vmem:[#allocation2 + $0x2] sm:$0x1] %v541_v23 }
 0x196   :  { %s828_s3 = scalar_lea.vmem [#allocation7], %s1592_s14 }
 0x198   :  { %s832_s23 = scalar_lea.vmem [#allocation7], %s1593_s0 }
 0x204   :  { %v227_v25 = vpop.permute.xlu0 %226 }
 0x205   :  { %v2130_v26 = vadd.f32 %v227_v25, %v219_v24  ;;  %v545_v25 = vld [vmem:[%s544_s15] sm:$0x1]  ;;  %s1594_s15 = sld [smem:[#allocation3 + $0x205]] }
 0x206   :  { %546 = vst [vmem:[#allocation2 + $0x3] sm:$0x1] %v545_v25  ;;  %v849_v25 = vld [vmem:[%s848_s27] sm:$0x1]  ;;  %s1617_s27 = sld [smem:[#allocation3 + $0x387]] }
 0x207   :  { %1808 = vtanh.f32 %v2130_v26 }
 0x20b   :  { %s836_s24 = scalar_lea.vmem [#allocation7], %s1594_s15  ;;  %s984_s15 = scalar_lea.vmem [#allocation7], %s1605_s6 }
 0x20c   :  { %v837_v22 = vld [vmem:[%s836_s24] sm:$0x1]  ;;  %s1615_s24 = sld [smem:[#allocation3 + $0x287]] }
 0x214   :  { %v1809_v27 = vpop.eup %1808 }
 0x215   :  { %232 = vrot.lane.b32.xlu1 %v1809_v27, %s1999_s21  ;;  %v549_v27 = vld [vmem:[%s548_s16] sm:$0x1]  ;;  %s1595_s16 = sld [smem:[#allocation3 + $0x285]] }
 0x216   :  { %550 = vst [vmem:[#allocation2 + $0x4] sm:$0x1] %v549_v27 }
 0x21b   :  { %s840_s25 = scalar_lea.vmem [#allocation7], %s1595_s16  ;;  %s988_s16 = scalar_lea.vmem [#allocation7], %s1606_s9 }
 0x21c   :  { %v841_v23 = vld [vmem:[%s840_s25] sm:$0x1]  ;;  %s1616_s25 = sld [smem:[#allocation3 + $0x307]]  ;;  %s1136_s9 = scalar_lea.vmem [#allocation7], %s1617_s27 }
 0x222   :  { %s1132_s6 = scalar_lea.vmem [#allocation7], %s1616_s25 }
 0x287   :  { %v233_v31 = vpop.permute.xlu1 %232 }
 0x288   :  { %v2134_v33 = vmul.f32 %v1807_v21, %v233_v31  ;;  %v533_v21 = vld [vmem:[%s532_s12] sm:$0x1]  ;;  %s1590_s12 = sld [smem:[#allocation3 + $0x5]] }
 0x289   :  { %534 = vst [vmem:[#allocation2] sm:$0x1] %v533_v21 }
 0x28a   :  { %281 = vrot.lane.b32.xlu1 %v2134_v33, %s2000_s22 }
 0x28e   :  { %s820_s18 = scalar_lea.vmem [#allocation7], %s1590_s12  ;;  %s968_s12 = scalar_lea.vmem [#allocation7], %s1601_s29 }
 0x290   :  { %v563_v32 = vld [vmem:[#allocation2] sm:$0xff] }
 0x291   :  { %694 = vst [vmem:[#allocation2 + $0x4] sm:$0x1] %v693_v54  ;;  %698 = vst [vmem:[#allocation2 + $0x5] sm:$0x1] %v697_v55 }
 0x292   :  { %702 = vst [vmem:[#allocation2 + $0x6] sm:$0x1] %v701_v56 }
 0x2fc   :  { %v282_v38 = vpop.permute.xlu1 %281 }
 0x2fd   :  { %1717 = vmatmul.mubr.msk.f32.vlgmr.msra.gmra.mxu0 %vm137_vm1, %v282_v38 }
 0x2fe   :  { %1720 = vmatpush3.msra.mxu0 %v2072_v0  ;;  %1727 = vmatprep.mubr.msk.f32.mxu0 %vm1998_vm0, %v1997_v1 }
 0x2ff   :  { %1721 = vmatprep.subr.mxu0 %v1997_v1 }
 0x300   :  { %1722 = vmatpush3.msra.mxu0 %v2075_v2 }
 0x301   :  { %1723 = vmatprep.subr.mxu0 %v1997_v1 }
 0x302   :  { %1724 = vmatpush3.msra.mxu0 %v2082_v3 }
 0x303   :  { %1725 = vmatprep.subr.mxu0 %v1997_v1 }
 0x304   :  { %1726 = vmatpush3.msra.mxu0 %v2090_v4 }
 0x305   :  { %1741 = vmatprep.subr.mxu0 %v1997_v1 }
 0x3bd   :  { %v351_v40 = vpop.f32.mrf.mxu0 }
 0x3be   :  { %v355_v41 = vadd.f32 %v351_v40, %v275_v39 }
 0x3bf   :  { %v1718_v42 = vpop.f32.mrf.mxu0 }
 0x3c0   :  { %1810 = vtanh.f32 %v355_v41  ;;  %v1559_v44 = vmul.f32 -1.442695, %v355_v41 }
 0x3c2   :  { %1812 = vpow2.f32 %v1559_v44 }
 0x3cd   :  { %v1811_v43 = vpop.eup %1810 }
 0x3ce   :  { %365 = vrot.lane.b32.xlu0 %v1811_v43, %s1999_s21 }
 0x3cf   :  { %v1813_v45 = vpop.eup %1812 }
 0x3d0   :  { %v359_v46 = vadd.f32 1.0, %v1813_v45 }
 0x3d2   :  { %1814 = vrcp.f32 %v359_v46 }
 0x3df   :  { %v1815_v47 = vpop.eup %1814 }
 0x3e0   :  { %v363_v50 = vmul.f32 %v1815_v47, %v2130_v26 }
 0x440   :  { %v366_v48 = vpop.permute.xlu0 %365 }
 0x441   :  { %v368_v49 = vmul.f32 %v1815_v47, %v366_v48  ;;  %v677_v48 = vld [vmem:[%s676_s28] sm:$0x1]  ;;  %s1600_s28 = sld [smem:[#allocation3 + $0x6]] }
 0x442   :  { %678 = vst [vmem:[#allocation2] sm:$0x1] %v677_v48  ;;  %v989_v48 = vld [vmem:[%s988_s16] sm:$0x1] }
 0x443   :  { %370 = vrot.lane.b32.xlu1 %v368_v49, %s2000_s22  ;;  %v681_v49 = vld [vmem:[%s680_s2] sm:$0x1]  ;;  %s1602_s2 = sld [smem:[#allocation3 + $0x106]] }
 0x444   :  { %682 = vst [vmem:[#allocation2 + $0x1] sm:$0x1] %v681_v49 }
 0x447   :  { %s964_s10 = scalar_lea.vmem [#allocation7], %s1600_s28  ;;  %s1112_s28 = scalar_lea.vmem [#allocation7], %s1611_s19 }
 0x449   :  { %s972_s13 = scalar_lea.vmem [#allocation7], %s1602_s2 }
 0x4b5   :  { %v371_v51 = vpop.permute.xlu1 %370 }
 0x4b6   :  { %v2152_v52 = vadd.f32 %v371_v51, %v363_v50  ;;  %v685_v50 = vld [vmem:[%s684_s30] sm:$0x1]  ;;  %s1603_s30 = sld [smem:[#allocation3 + $0x186]] }
 0x4b7   :  { %686 = vst [vmem:[#allocation2 + $0x2] sm:$0x1] %v685_v50 }
 0x4b8   :  { %1816 = vtanh.f32 %v2152_v52 }
 0x4bc   :  { %s976_s14 = scalar_lea.vmem [#allocation7], %s1603_s30 }
 0x4c5   :  { %v1817_v53 = vpop.eup %1816 }
 0x4c6   :  { %376 = vrot.lane.b32.xlu0 %v1817_v53, %s1999_s21 }
 0x538   :  { %v377_v57 = vpop.permute.xlu0 %376 }
 0x539   :  { %v2156_v59 = vmul.f32 %v1815_v47, %v377_v57  ;;  %v705_v57 = vld [vmem:[%s704_s11] sm:$0x1]  ;;  %s1607_s11 = sld [smem:[#allocation3 + $0x386]] }
 0x53a   :  { %706 = vst [vmem:[#allocation2 + $0x7] sm:$0x1] %v705_v57 }
 0x53b   :  { %425 = vrot.lane.b32.xlu1 %v2156_v59, %s2000_s22 }
 0x53f   :  { %s992_s17 = scalar_lea.vmem [#allocation7], %s1607_s11 }
 0x540   :  { %v993_v49 = vld [vmem:[%s992_s17] sm:$0x1] }
 0x5ad   :  { %v426_v5 = vpop.permute.xlu1 %425 }
 0x5ae   :  { %1728 = vmatmul.mubr.msk.f32.vlgmr.msra.gmra.mxu0 %vm137_vm1, %v426_v5 }
 0x5af   :  { %1742 = vmatpush3.msra.mxu0 %v2072_v0  ;;  %1749 = vmatprep.mubr.msk.f32.mxu0 %vm1998_vm0, %v1997_v1 }
 0x5b0   :  { %1743 = vmatprep.subr.mxu0 %v1997_v1 }
 0x5b1   :  { %1744 = vmatpush3.msra.mxu0 %v2075_v2 }
 0x5b2   :  { %1745 = vmatprep.subr.mxu0 %v1997_v1 }
 0x5b3   :  { %1746 = vmatpush3.msra.mxu0 %v2082_v3 }
 0x5b4   :  { %1747 = vmatprep.subr.mxu0 %v1997_v1 }
 0x5b5   :  { %1748 = vmatpush3.msra.mxu0 %v2090_v4 }
 0x5b6   :  { %1763 = vmatprep.subr.mxu0 %v1997_v1 }
 0x66e   :  { %v495_v7 = vpop.f32.mrf.mxu0 }
 0x66f   :  { %v499_v8 = vadd.f32 %v495_v7, %v419_v6 }
 0x670   :  { %v1729_v9 = vpop.f32.mrf.mxu0 }
 0x671   :  { %1818 = vtanh.f32 %v499_v8  ;;  %v1569_v11 = vmul.f32 -1.442695, %v499_v8 }
 0x673   :  { %1820 = vpow2.f32 %v1569_v11 }
 0x67e   :  { %v1819_v10 = vpop.eup %1818 }
 0x67f   :  { %509 = vrot.lane.b32.xlu0 %v1819_v10, %s1999_s21 }
 0x680   :  { %v1821_v12 = vpop.eup %1820 }
 0x681   :  { %v503_v13 = vadd.f32 1.0, %v1821_v12 }
 0x683   :  { %1822 = vrcp.f32 %v503_v13 }
 0x690   :  { %v1823_v14 = vpop.eup %1822 }
 0x691   :  { %v507_v17 = vmul.f32 %v1823_v14, %v2152_v52  ;;  %v689_v52 = vld [vmem:[%s688_s4] sm:$0x1]  ;;  %s1604_s4 = sld [smem:[#allocation3 + $0x206]] }
 0x692   :  { %690 = vst [vmem:[#allocation2 + $0x3] sm:$0x1] %v689_v52 }
 0x697   :  { %s980_s0 = scalar_lea.vmem [#allocation7], %s1604_s4  ;;  %s1128_s4 = scalar_lea.vmem [#allocation7], %s1615_s24 }
 0x699   :  { %v707_v60 = vld [vmem:[#allocation2] sm:$0xff] }
 0x69a   :  { %838 = vst [vmem:[#allocation2 + $0x4] sm:$0x1] %v837_v22  ;;  %842 = vst [vmem:[#allocation2 + $0x5] sm:$0x1] %v841_v23 }
 0x69b   :  { %850 = vst [vmem:[#allocation2 + $0x7] sm:$0x1] %v849_v25  ;;  %v98_v25 = vld [vmem:[%s2287_s1] sm:$0xff] }
 0x6f1   :  { %v510_v15 = vpop.permute.xlu0 %509 }
 0x6f2   :  { %v512_v16 = vmul.f32 %v1823_v14, %v510_v15 }
 0x6f4   :  { %514 = vrot.lane.b32.xlu1 %v512_v16, %s2000_s22  ;;  %v821_v16 = vld [vmem:[%s820_s18] sm:$0x1]  ;;  %s1610_s18 = sld [smem:[#allocation3 + $0x7]] }
 0x6f5   :  { %822 = vst [vmem:[#allocation2] sm:$0x1] %v821_v16  ;;  %v1133_v16 = vld [vmem:[%s1132_s6] sm:$0x1] }
 0x766   :  { %v515_v18 = vpop.permute.xlu1 %514 }
 0x767   :  { %v2174_v19 = vadd.f32 %v515_v18, %v507_v17  ;;  %v825_v17 = vld [vmem:[%s824_s20] sm:$0x1]  ;;  %s1612_s20 = sld [smem:[#allocation3 + $0x107]] }
 0x768   :  { %826 = vst [vmem:[#allocation2 + $0x1] sm:$0x1] %v825_v17  ;;  %v829_v18 = vld [vmem:[%s828_s3] sm:$0x1]  ;;  %s1613_s3 = sld [smem:[#allocation3 + $0x187]] }
 0x769   :  { %1824 = vtanh.f32 %v2174_v19  ;;  %830 = vst [vmem:[#allocation2 + $0x2] sm:$0x1] %v829_v18  ;;  %v1137_v17 = vld [vmem:[%s1136_s9] sm:$0x1] }
 0x76d   :  { %s1116_s29 = scalar_lea.vmem [#allocation7], %s1612_s20 }
 0x76e   :  { %s1120_s2 = scalar_lea.vmem [#allocation7], %s1613_s3 }
 0x776   :  { %v1825_v20 = vpop.eup %1824 }
 0x777   :  { %520 = vrot.lane.b32.xlu0 %v1825_v20, %s1999_s21  ;;  %v833_v20 = vld [vmem:[%s832_s23] sm:$0x1]  ;;  %s1614_s23 = sld [smem:[#allocation3 + $0x207]] }
 0x778   :  { %834 = vst [vmem:[#allocation2 + $0x3] sm:$0x1] %v833_v20 }
 0x77d   :  { %s1124_s30 = scalar_lea.vmem [#allocation7], %s1614_s23 }
 0x7e9   :  { %v521_v24 = vpop.permute.xlu0 %520 }
 0x7ea   :  { %v2178_v26 = vmul.f32 %v1823_v14, %v521_v24  ;;  %v845_v24 = vld [vmem:[%s844_s26] sm:$0x1]  ;;  %s1108_s26 = scalar_lea.vmem [#allocation7], %s1610_s18 }
 0x7eb   :  { %846 = vst [vmem:[#allocation2 + $0x6] sm:$0x1] %v845_v24 }
 0x7ec   :  { %569 = vrot.lane.b32.xlu1 %v2178_v26, %s2000_s22 }
 0x7f2   :  { %v851_v28 = vld [vmem:[#allocation2] sm:$0xff] }
 0x7f3   :  { %990 = vst [vmem:[#allocation2 + $0x6] sm:$0x1] %v989_v48  ;;  %994 = vst [vmem:[#allocation2 + $0x7] sm:$0x1] %v993_v49  ;;  %v1254_v48 = vld [vmem:[#allocation10 + $0x18] sm:$0xff]  ;;  %v1253_v49 = vld [vmem:[#allocation10 + $0x10] sm:$0xff] }
 0x85e   :  { %v570_v31 = vpop.permute.xlu1 %569 }
 0x85f   :  { %1739 = vmatmul.mubr.msk.f32.vlgmr.msra.gmra.mxu1 %vm137_vm1, %v570_v31 }
 0x860   :  { %1753 = vmatpush3.msra.mxu1 %v2072_v0  ;;  %1760 = vmatprep.mubr.msk.f32.mxu1 %vm1998_vm0, %v1997_v1 }
 0x861   :  { %1754 = vmatprep.subr.mxu1 %v1997_v1 }
 0x862   :  { %1755 = vmatpush3.msra.mxu1 %v2075_v2 }
 0x863   :  { %1756 = vmatprep.subr.mxu1 %v1997_v1 }
 0x864   :  { %1757 = vmatpush3.msra.mxu1 %v2082_v3 }
 0x865   :  { %1758 = vmatprep.subr.mxu1 %v1997_v1 }
 0x866   :  { %1759 = vmatpush3.msra.mxu1 %v2090_v4 }
 0x867   :  { %1774 = vmatprep.subr.mxu1 %v1997_v1 }
 0x91f   :  { %v639_v34 = vpop.f32.mrf.mxu1 }
 0x920   :  { %v643_v35 = vadd.f32 %v639_v34, %v563_v32 }
 0x921   :  { %v1740_v36 = vpop.f32.mrf.mxu1 }
 0x922   :  { %1826 = vtanh.f32 %v643_v35  ;;  %v1579_v38 = vmul.f32 -1.442695, %v643_v35 }
 0x924   :  { %1828 = vpow2.f32 %v1579_v38 }
 0x92f   :  { %v1827_v37 = vpop.eup %1826 }
 0x930   :  { %653 = vrot.lane.b32.xlu0 %v1827_v37, %s1999_s21 }
 0x931   :  { %v1829_v39 = vpop.eup %1828 }
 0x932   :  { %v647_v40 = vadd.f32 1.0, %v1829_v39 }
 0x934   :  { %1830 = vrcp.f32 %v647_v40  ;;  %v965_v40 = vld [vmem:[%s964_s10] sm:$0x1] }
 0x935   :  { %966 = vst [vmem:[#allocation2] sm:$0x1] %v965_v40 }
 0x941   :  { %v1831_v41 = vpop.eup %1830 }
 0x942   :  { %v651_v44 = vmul.f32 %v1831_v41, %v2174_v19 }
 0x9a2   :  { %v654_v42 = vpop.permute.xlu0 %653 }
 0x9a3   :  { %v656_v43 = vmul.f32 %v1831_v41, %v654_v42  ;;  %v973_v42 = vld [vmem:[%s972_s13] sm:$0x1]  ;;  %s2002_s13 = smov [#allocation13]  }
 0x9a4   :  { %974 = vst [vmem:[#allocation2 + $0x2] sm:$0x1] %v973_v42 }
 0x9a5   :  { %658 = vrot.lane.b32.xlu1 %v656_v43, %s2000_s22 }
 0xa17   :  { %v659_v45 = vpop.permute.xlu1 %658 }
 0xa18   :  { %v2196_v46 = vadd.f32 %v659_v45, %v651_v44  ;;  %v977_v44 = vld [vmem:[%s976_s14] sm:$0x1]  ;;  %s1465_s14 = sshll.u32 %s2002_s13, 4  ;;  %s1466_s14 = int_to_ptr.vmem [resolvable:$true] %s1465_s14 }
 0xa19   :  { %978 = vst [vmem:[#allocation2 + $0x3] sm:$0x1] %v977_v44  ;;  %v1257_v44 = vld [vmem:[#allocation10 + $0x30] sm:$0xff]  ;;  %p1963_p12 = scmp.lt.s32.totalorder %s1466_s14, %s1466_s14 }
 0xa1a   :  { %1832 = vtanh.f32 %v2196_v46 }
 0xa27   :  { %v1833_v47 = vpop.eup %1832 }
 0xa28   :  { %664 = vrot.lane.b32.xlu0 %v1833_v47, %s1999_s21  ;;  %v985_v47 = vld [vmem:[%s984_s15] sm:$0x1] }
 0xa29   :  { %986 = vst [vmem:[#allocation2 + $0x5] sm:$0x1] %v985_v47  ;;  %v1255_v47 = vld [vmem:[#allocation10 + $0x20] sm:$0xff] }
 0xa9a   :  { %v665_v51 = vpop.permute.xlu0 %664 }
 0xa9b   :  { %v2200_v53 = vmul.f32 %v1831_v41, %v665_v51  ;;  %v969_v41 = vld [vmem:[%s968_s12] sm:$0x1] }
 0xa9c   :  { %970 = vst [vmem:[#allocation2 + $0x1] sm:$0x1] %v969_v41 }
 0xa9d   :  { %713 = vrot.lane.b32.xlu1 %v2200_v53, %s2000_s22 }
 0xb0f   :  { %v714_v58 = vpop.permute.xlu1 %713 }
 0xb10   :  { %1750 = vmatmul.mubr.msk.f32.vlgmr.msra.gmra.mxu0 %vm137_vm1, %v714_v58 }
 0xb11   :  { %1764 = vmatpush3.msra.mxu0 %v2072_v0  ;;  %1771 = vmatprep.mubr.msk.f32.mxu0 %vm1998_vm0, %v1997_v1 }
 0xb12   :  { %1765 = vmatprep.subr.mxu0 %v1997_v1 }
 0xb13   :  { %1766 = vmatpush3.msra.mxu0 %v2075_v2 }
 0xb14   :  { %1767 = vmatprep.subr.mxu0 %v1997_v1 }
 0xb15   :  { %1768 = vmatpush3.msra.mxu0 %v2082_v3 }
 0xb16   :  { %1769 = vmatprep.subr.mxu0 %v1997_v1 }
 0xb17   :  { %1770 = vmatpush3.msra.mxu0 %v2090_v4 }
 0xbd0   :  { %v783_v61 = vpop.f32.mrf.mxu0 }
 0xbd1   :  { %v787_v62 = vadd.f32 %v783_v61, %v707_v60 }
 0xbd2   :  { %v1751_v63 = vpop.f32.mrf.mxu0 }
 0xbd3   :  { %1834 = vtanh.f32 %v787_v62  ;;  %v1589_v6 = vmul.f32 -1.442695, %v787_v62 }
 0xbd5   :  { %1836 = vpow2.f32 %v1589_v6 }
 0xbe0   :  { %v1835_v5 = vpop.eup %1834 }
 0xbe1   :  { %797 = vrot.lane.b32.xlu0 %v1835_v5, %s1999_s21 }
 0xbe2   :  { %v1837_v7 = vpop.eup %1836 }
 0xbe3   :  { %v791_v8 = vadd.f32 1.0, %v1837_v7 }
 0xbe5   :  { %1838 = vrcp.f32 %v791_v8  ;;  %v1109_v8 = vld [vmem:[%s1108_s26] sm:$0x1] }
 0xbf2   :  { %v1839_v9 = vpop.eup %1838 }
 0xbf3   :  { %v795_v12 = vmul.f32 %v1839_v9, %v2196_v46  ;;  %v981_v46 = vld [vmem:[%s980_s0] sm:$0x1] }
 0xbf4   :  { %982 = vst [vmem:[#allocation2 + $0x4] sm:$0x1] %v981_v46  ;;  %v1256_v46 = vld [vmem:[#allocation10 + $0x28] sm:$0xff] }
 0xbfb   :  { %v995_v51 = vld [vmem:[#allocation2] sm:$0xff] }
 0xbfc   :  { %1110 = vst [vmem:[#allocation2] sm:$0x1] %v1109_v8  ;;  %1134 = vst [vmem:[#allocation2 + $0x6] sm:$0x1] %v1133_v16  ;;  %v1362_v8 = vld [vmem:[#allocation11 + $0x68] sm:$0xff]  ;;  %v1375_v16 = vld [vmem:[#allocation11 + $0xd0] sm:$0xff] }
 0xbfd   :  { %1138 = vst [vmem:[#allocation2 + $0x7] sm:$0x1] %v1137_v17 }
 0xc53   :  { %v798_v10 = vpop.permute.xlu0 %797 }
 0xc54   :  { %v800_v11 = vmul.f32 %v1839_v9, %v798_v10  ;;  %v1117_v10 = vld [vmem:[%s1116_s29] sm:$0x1] }
 0xc55   :  { %1118 = vst [vmem:[#allocation2 + $0x2] sm:$0x1] %v1117_v10  ;;  %v1377_v10 = vld [vmem:[#allocation11 + $0xe0] sm:$0xff] }
 0xc56   :  { %802 = vrot.lane.b32.xlu1 %v800_v11, %s2000_s22 }
 0xcc8   :  { %v803_v13 = vpop.permute.xlu1 %802 }
 0xcc9   :  { %v2217_v14 = vadd.f32 %v803_v13, %v795_v12  ;;  %v1121_v12 = vld [vmem:[%s1120_s2] sm:$0x1] }
 0xcca   :  { %1122 = vst [vmem:[#allocation2 + $0x3] sm:$0x1] %v1121_v12  ;;  %v1361_v12 = vld [vmem:[#allocation11 + $0x60] sm:$0xff] }
 0xccb   :  { %1840 = vtanh.f32 %v2217_v14 }
 0xcd8   :  { %v1841_v15 = vpop.eup %1840 }
 0xcd9   :  { %808 = vrot.lane.b32.xlu0 %v1841_v15, %s1999_s21  ;;  %v1129_v15 = vld [vmem:[%s1128_s4] sm:$0x1] }
 0xcda   :  { %1130 = vst [vmem:[#allocation2 + $0x5] sm:$0x1] %v1129_v15  ;;  %v1360_v15 = vld [vmem:[#allocation11 + $0x58] sm:$0xff] }
 0xd4b   :  { %v809_v19 = vpop.permute.xlu0 %808 }
 0xd4c   :  { %v2221_v21 = vmul.f32 %v1839_v9, %v809_v19  ;;  %v1113_v9 = vld [vmem:[%s1112_s28] sm:$0x1]  ;;  %v2001_v19 = vmov 0  }
 0xd4d   :  { %1114 = vst [vmem:[#allocation2 + $0x1] sm:$0x1] %v1113_v9  ;;  %1800 = vset.pattern.permute.xlu0 %v2001_v19  ;;  %1801 = vset.pattern.permute.xlu1 %v2001_v19 }
 0xd4e   :  { %857 = vrot.lane.b32.xlu1 %v2221_v21, %s2000_s22 }
 0xdc0   :  { %v858_v27 = vpop.permute.xlu1 %857 }
 0xdc1   :  { %1761 = vmatmul.mubr.msk.f32.vlgmr.msra.gmra.mxu1 %vm137_vm1, %v858_v27  ;;  %v1541_v27 = vadd.s32 4294967295, %v98_v25  ;;  %v1357_v25 = vld [vmem:[#allocation11 + $0x40] sm:$0xff] }
 0xdc2   :  { %1775 = vmatpush3.msra.mxu1 %v2072_v0  ;;  %1782 = vmatprep.mubr.msk.f32.mxu1 %vm1998_vm0, %v1997_v1 }
 0xdc3   :  { %1776 = vmatprep.subr.mxu1 %v1997_v1  ;;  %vm236_vm2 = vcmp.eq.s32.totalorder %v1541_v27, 0  ;;  %vm668_vm3 = vcmp.eq.s32.totalorder %v1541_v27, 3  ;;  %vm956_vm4 = vcmp.eq.s32.totalorder %v1541_v27, 5  ;;  %vm1244_vm5 = vcmp.eq.s32.totalorder %v1541_v27, 7 }
 0xdc4   :  { %1777 = vmatpush3.msra.mxu1 %v2075_v2  ;;  %vm380_vm6 = vcmp.eq.s32.totalorder %v1541_v27, 1  ;;  %vm524_vm7 = vcmp.eq.s32.totalorder %v1541_v27, 2  ;;  %vm812_vm8 = vcmp.eq.s32.totalorder %v1541_v27, 4  ;;  %vm1100_vm9 = vcmp.eq.s32.totalorder %v1541_v27, 6  ;;  %v1372_v27 = vld [vmem:[#allocation11 + $0xb8] sm:$0xff] }
 0xdc5   :  { %1778 = vmatprep.subr.mxu1 %v1997_v1 }
 0xdc6   :  { %1779 = vmatpush3.msra.mxu1 %v2082_v3 }
 0xdc7   :  { %1780 = vmatprep.subr.mxu1 %v1997_v1 }
 0xdc8   :  { %1781 = vmatpush3.msra.mxu1 %v2090_v4 }
 0xe81   :  { %v927_v29 = vpop.f32.mrf.mxu1 }
 0xe82   :  { %v931_v30 = vadd.f32 %v927_v29, %v851_v28  ;;  %v237_v29 = vsel %vm236_vm2, 1, %v2001_v19 }
 0xe83   :  { %v1762_v31 = vpop.f32.mrf.mxu1 }
 0xe84   :  { %1842 = vtanh.f32 %v931_v30  ;;  %v1599_v32 = vmul.f32 -1.442695, %v931_v30  ;;  %v669_v30 = vsel %vm668_vm3, 1, %v2001_v19  ;;  %v957_v31 = vsel %vm956_vm4, 1, %v2001_v19 }
 0xe86   :  { %1844 = vpow2.f32 %v1599_v32 }
 0xe91   :  { %v1843_v0 = vpop.eup %1842 }
 0xe92   :  { %941 = vrot.lane.b32.xlu0 %v1843_v0, %s1999_s21  ;;  %v1245_v0 = vsel %vm1244_vm5, 1, %v2001_v19 }
 0xe93   :  { %v1845_v34 = vpop.eup %1844 }
 0xe94   :  { %v935_v2 = vadd.f32 1.0, %v1845_v34 }
 0xe96   :  { %1846 = vrcp.f32 %v935_v2 }
 0xea3   :  { %v1847_v35 = vpop.eup %1846 }
 0xea4   :  { %v939_v4 = vmul.f32 %v1847_v35, %v2217_v14  ;;  %v1125_v14 = vld [vmem:[%s1124_s30] sm:$0x1] }
 0xea5   :  { %1126 = vst [vmem:[#allocation2 + $0x4] sm:$0x1] %v1125_v14  ;;  %v1376_v14 = vld [vmem:[#allocation11 + $0xd8] sm:$0xff] }
 0xeac   :  { %v1139_v20 = vld [vmem:[#allocation2] sm:$0xff] }
 0xf04   :  { %v942_v36 = vpop.permute.xlu0 %941 }
 0xf05   :  { %v944_v3 = vmul.f32 %v1847_v35, %v942_v36 }
 0xf07   :  { %946 = vrot.lane.b32.xlu1 %v944_v3, %s2000_s22 }
 0xf79   :  { %v947_v37 = vpop.permute.xlu1 %946 }
 0xf7a   :  { %v949_v38 = vadd.f32 %v947_v37, %v939_v4  ;;  %v381_v4 = vsel %vm380_vm6, 1, %v2001_v19  ;;  %v525_v37 = vsel %vm524_vm7, 1, %v2001_v19 }
 0xf7c   :  { %1848 = vtanh.f32 %v949_v38 }
 0xf89   :  { %v1849_v39 = vpop.eup %1848 }
 0xf8a   :  { %952 = vrot.lane.b32.xlu0 %v1849_v39, %s1999_s21  ;;  %v1101_v39 = vsel %vm1100_vm9, 1, %v2001_v19 }
 0xffc   :  { %v953_v43 = vpop.permute.xlu0 %952 }
 0xffd   :  { %v2239_v45 = vmul.f32 %v1847_v35, %v953_v43  ;;  %v1258_v43 = vld [vmem:[#allocation10 + $0x38] sm:$0xff] }
 0xffe   :  { %1300 = vmatprep.subr.mxu0 %v1258_v43 }
 0xfff   :  { %1001 = vrot.lane.b32.xlu1 %v2239_v45, %s2000_s22 }
0x1071   :  { %v1002_v50 = vpop.permute.xlu1 %1001 }
0x1072   :  { %1772 = vmatmul.mubr.msk.f32.vlgmr.msra.gmra.mxu0 %vm137_vm1, %v1002_v50  ;;  %v1252_v50 = vld [vmem:[#allocation10 + $0x8] sm:$0xff] }
0x1073   :  { %1340 = vmatprep.mubr.f32.mxu0 %v1997_v1  ;;  %1301 = vmatpush1.msra.mxu0 %v1257_v44 }
0x1074   :  { %1302 = vmatprep.subr.mxu0 %v1256_v46 }
0x1075   :  { %1303 = vmatpush1.msra.mxu0 %v1255_v47 }
0x1076   :  { %1304 = vmatprep.subr.mxu0 %v1254_v48 }
0x1077   :  { %1305 = vmatpush1.msra.mxu0 %v1253_v49 }
0x1078   :  { %1306 = vmatprep.subr.mxu0 %v1252_v50 }
0x1132   :  { %v1071_v52 = vpop.f32.mrf.mxu0 }
0x1133   :  { %v1075_v54 = vadd.f32 %v1071_v52, %v995_v51  ;;  %v1251_v51 = vld [vmem:[#allocation10] sm:$0xff] }
0x1134   :  { %v1773_v55 = vpop.f32.mrf.mxu0  ;;  %1307 = vmatpush1.msra.mxu0 %v1251_v51 }
0x1135   :  { %1850 = vtanh.f32 %v1075_v54  ;;  %v1609_v57 = vmul.f32 -1.442695, %v1075_v54 }
0x1137   :  { %1852 = vpow2.f32 %v1609_v57 }
0x1142   :  { %v1851_v56 = vpop.eup %1850 }
0x1143   :  { %1085 = vrot.lane.b32.xlu0 %v1851_v56, %s1999_s21 }
0x1144   :  { %v1853_v58 = vpop.eup %1852 }
0x1145   :  { %v1079_v60 = vadd.f32 1.0, %v1853_v58 }
0x1147   :  { %1854 = vrcp.f32 %v1079_v60  ;;  %v1380_v60 = vld [vmem:[#allocation11 + $0xf8] sm:$0xff] }
0x1148   :  { %1662 = vmatprep.subr.mxu1 %v1380_v60 }
0x1154   :  { %v1855_v61 = vpop.eup %1854 }
0x1155   :  { %v1083_v5 = vmul.f32 %v1855_v61, %v949_v38  ;;  %v813_v38 = vsel %vm812_vm8, 1, %v2001_v19 }
0x11b5   :  { %v1086_v62 = vpop.permute.xlu0 %1085 }
0x11b6   :  { %v1088_v63 = vmul.f32 %v1855_v61, %v1086_v62  ;;  %v1379_v62 = vld [vmem:[#allocation11 + $0xf0] sm:$0xff] }
0x11b8   :  { %1090 = vrot.lane.b32.xlu1 %v1088_v63, %s2000_s22 }
0x122a   :  { %v1091_v1 = vpop.permute.xlu1 %1090 }
0x122b   :  { %v2247_v6 = vadd.f32 %v1091_v1, %v1083_v5  ;;  %v1363_v5 = vld [vmem:[#allocation11 + $0x70] sm:$0xff] }
0x122d   :  { %1856 = vtanh.f32 %v2247_v6 }
0x123a   :  { %v1857_v7 = vpop.eup %1856 }
0x123b   :  { %1096 = vrot.lane.b32.xlu0 %v1857_v7, %s1999_s21 }
0x12ad   :  { %v1097_v11 = vpop.permute.xlu0 %1096 }
0x12ae   :  { %v2251_v13 = vmul.f32 %v1855_v61, %v1097_v11  ;;  %v1364_v61 = vld [vmem:[#allocation11 + $0x78] sm:$0xff] }
0x12b0   :  { %1145 = vrot.lane.b32.xlu1 %v2251_v13, %s2000_s22 }
0x1322   :  { %v1146_v18 = vpop.permute.xlu1 %1145 }
0x1323   :  { %1783 = vmatmul.mubr.msk.f32.vlgmr.msra.gmra.mxu1 %vm137_vm1, %v1146_v18  ;;  %v1359_v18 = vld [vmem:[#allocation11 + $0x50] sm:$0xff] }
0x1324   :  { %1663 = vmatpush3.msra.mxu1 %v1364_v61 }
0x1325   :  { %1664 = vmatprep.subr.mxu1 %v1379_v62 }
0x1326   :  { %1665 = vmatpush3.msra.mxu1 %v1363_v5 }
0x13e3   :  { %v1215_v22 = vpop.f32.mrf.mxu1 }
0x13e4   :  { %v1219_v23 = vadd.f32 %v1215_v22, %v1139_v20 }
0x13e5   :  { %v1784_v24 = vpop.f32.mrf.mxu1 }
0x13e6   :  { %1858 = vtanh.f32 %v1219_v23  ;;  %v1619_v32 = vmul.f32 -1.442695, %v1219_v23  ;;  %v1373_v24 = vld [vmem:[#allocation11 + $0xc0] sm:$0xff] }
0x13e8   :  { %1860 = vpow2.f32 %v1619_v32 }
0x13f3   :  { %v1859_v28 = vpop.eup %1858 }
0x13f4   :  { %1229 = vrot.lane.b32.xlu0 %v1859_v28, %s1999_s21  ;;  %v1371_v28 = vld [vmem:[#allocation11 + $0xb0] sm:$0xff] }
0x13f5   :  { %v1861_v34 = vpop.eup %1860 }
0x13f6   :  { %v1223_v2 = vadd.f32 1.0, %v1861_v34  ;;  %v1368_v34 = vld [vmem:[#allocation11 + $0x98] sm:$0xff] }
0x13f8   :  { %239 = vperm.xlu0 %1800, %v237_v29   ;;  %1862 = vrcp.f32 %v1223_v2  ;;  %v1355_v29 = vld [vmem:[#allocation11 + $0x30] sm:$0xff]  ;;  %v1352_v2 = vld [vmem:[#allocation11 + $0x18] sm:$0xff] }
0x13fc   :  { %671 = vperm.xlu0 %1800, %v669_v30   ;;  %v1354_v30 = vld [vmem:[#allocation11 + $0x28] sm:$0xff] }
0x1400   :  { %959 = vperm.xlu0 %1800, %v957_v31   ;;  %v1369_v31 = vld [vmem:[#allocation11 + $0xa0] sm:$0xff] }
0x1404   :  { %1247 = vperm.xlu0 %1800, %v1245_v0   ;;  %v1353_v0 = vld [vmem:[#allocation11 + $0x20] sm:$0xff] }
0x1405   :  { %v2260_v35 = vpop.eup %1862 }
0x1406   :  { %v1227_v40 = vmul.f32 %v2260_v35, %v2247_v6  ;;  %v1378_v6 = vld [vmem:[#allocation11 + $0xe8] sm:$0xff] }
0x1407   :  { %1666 = vmatprep.subr.mxu1 %v1378_v6 }
0x1408   :  { %1667 = vmatpush3.msra.mxu1 %v1362_v8 }
0x1409   :  { %1668 = vmatprep.subr.mxu1 %v1377_v10 }
0x140a   :  { %1669 = vmatpush3.msra.mxu1 %v1361_v12 }
0x140b   :  { %1670 = vmatprep.subr.mxu1 %v1376_v14 }
0x140c   :  { %1671 = vmatpush3.msra.mxu1 %v1360_v15 }
0x140d   :  { %1672 = vmatprep.subr.mxu1 %v1375_v16 }
0x140e   :  { %1673 = vmatpush3.msra.mxu1 %v1359_v18 }
0x1466   :  { %v1230_v36 = vpop.permute.xlu0 %1229 }
0x1467   :  { %v1232_v3 = vmul.f32 %v2260_v35, %v1230_v36  ;;  %v1351_v36 = vld [vmem:[#allocation11 + $0x10] sm:$0xff] }
0x1469   :  { %1234 = vrot.lane.b32.xlu1 %v1232_v3, %s2000_s22  ;;  %v1366_v3 = vld [vmem:[#allocation11 + $0x88] sm:$0xff] }
0x146d   :  { %383 = vperm.xlu1 %1801, %v381_v4   ;;  %v1350_v4 = vld [vmem:[#allocation11 + $0x8] sm:$0xff] }
0x1471   :  { %527 = vperm.xlu1 %1801, %v525_v37   ;;  %v1365_v37 = vld [vmem:[#allocation11 + $0x80] sm:$0xff] }
0x1473   :  { %v240_v56 = vpop.permute.xlu0 %239 }
0x1474   :  { %vm241_vm10 = vcmp.eq.s32.totalorder %v240_v56, 1  ;;  %v1621_v56 = vld [vmem:[%s2293_s7] ss:$0 sm:$0xff] }
0x1475   :  { %815 = vperm.xlu1 %1801, %v813_v38   ;;  %v242_v63 = vsel %vm241_vm10, %v2134_v33, 0.0  ;;  %v1349_v38 = vld [vmem:[#allocation11] sm:$0xff] }
0x1477   :  { %v672_v57 = vpop.permute.xlu0 %671 }
0x1478   :  { %vm673_vm13 = vcmp.eq.s32.totalorder %v672_v57, 1 }
0x1479   :  { %1103 = vperm.xlu1 %1801, %v1101_v39   ;;  %v1261_v39 = vlaneseq }
0x147b   :  { %v960_v9 = vpop.permute.xlu0 %959 }
0x147c   :  { %vm961_vm15 = vcmp.eq.s32.totalorder %v960_v9, 1 }
0x14db   :  { %v1235_v41 = vpop.permute.xlu1 %1234 }
0x14dc   :  { %v1237_v42 = vadd.f32 %v1235_v41, %v1227_v40  ;;  %v1262_v40 = vshrl.u32 %v1261_v39, 7 }
0x14de   :  { %1864 = vtanh.f32 %v1237_v42  ;;  %v1263_v41 = vsub.s32 0, %v1262_v40  ;;  %v1259_v42 = vld [vmem:[%s2291_s5] sm:$0x3]  ;;  %v1267_v43 = vsub.s32 1, %v1262_v40  ;;  %s1958_s5 = scalar_lea.vmem %s1466_s14, 128 }
0x14df   :  { %p1959_p11 = scmp.ne.s32.totalorder %s1466_s14, %s1958_s5  ;;  %p1964_p13 = scmp.lt.s32.totalorder %s1958_s5, %s1958_s5 }
0x14e0   :  { %v1264_v44 = vrot.slane %v1259_v42, %v1263_v41  ;;  %v1268_v46 = vrot.slane %v1259_v42, %v1267_v43 }
0x14e1   :  { %p1965_p0 = por %p1964_p13, %p1963_p12 }
0x14e3   :  { %p1966_p1 = pnand %p1965_p0, %p1959_p11 }
0x14e8   :  { %v384_v54 = vpop.permute.xlu1 %383 }
0x14e9   :  { %vm385_vm11 = vcmp.eq.s32.totalorder %v384_v54, 1 }
0x14ea   :  { %v386_v1 = vsel %vm385_vm11, %v2156_v59, %v242_v63 }
0x14eb   :  { %v1865_v52 = vpop.eup %1864 }
0x14ec   :  { %1240 = vrot.lane.b32.xlu1 %v1865_v52, %s1999_s21  ;;  %v528_v55 = vpop.permute.xlu1 %527 }
0x14ed   :  { %vm529_vm12 = vcmp.eq.s32.totalorder %v528_v55, 1 }
0x14ee   :  { %v530_v7 = vsel %vm529_vm12, %v2178_v26, %v386_v1  ;;  %v1248_v26 = vpop.permute.xlu0 %1247 }
0x14ef   :  { %v674_v33 = vsel %vm673_vm13, %v2200_v53, %v530_v7  ;;  %v1374_v53 = vld [vmem:[#allocation11 + $0xc8] sm:$0xff]  ;;  %vm1249_vm2 = vcmp.eq.s32.totalorder %v1248_v26, 1 }
0x14f0   :  { %v816_v58 = vpop.permute.xlu1 %815  ;;  %1674 = vmatprep.subr.mxu1 %v1374_v53 }
0x14f1   :  { %vm817_vm14 = vcmp.eq.s32.totalorder %v816_v58, 1 }
0x14f2   :  { %v818_v59 = vsel %vm817_vm14, %v2221_v21, %v674_v33  ;;  %v1358_v21 = vld [vmem:[#allocation11 + $0x48] sm:$0xff] }
0x14f3   :  { %v962_v19 = vsel %vm961_vm15, %v2239_v45, %v818_v59  ;;  %1675 = vmatpush3.msra.mxu1 %v1358_v21  ;;  %v1356_v45 = vld [vmem:[#allocation11 + $0x38] sm:$0xff] }
0x14f4   :  { %v1104_v11 = vpop.permute.xlu1 %1103  ;;  %1676 = vmatprep.subr.mxu1 %v1373_v24 }
0x14f5   :  { %vm1105_vm0 = vcmp.eq.s32.totalorder %v1104_v11, 1  ;;  %1677 = vmatpush3.msra.mxu1 %v1357_v25 }
0x14f6   :  { %v1106_v22 = vsel %vm1105_vm0, %v2251_v13, %v962_v19  ;;  %1678 = vmatprep.subr.mxu1 %v1372_v27  ;;  %v1370_v13 = vld [vmem:[#allocation11 + $0xa8] sm:$0xff] }
0x14f7   :  { %1679 = vmatpush3.msra.mxu1 %v1356_v45 }
0x14f8   :  { %1680 = vmatprep.subr.mxu1 %v1371_v28 }
0x14f9   :  { %1681 = vmatpush3.msra.mxu1 %v1355_v29 }
0x14fa   :  { %1682 = vmatprep.subr.mxu1 %v1370_v13 }
0x14fb   :  { %1683 = vmatpush3.msra.mxu1 %v1354_v30 }
0x14fc   :  { %1684 = vmatprep.subr.mxu1 %v1369_v31 }
0x14fd   :  { %1685 = vmatpush3.msra.mxu1 %v1353_v0 }
0x14fe   :  { %1686 = vmatprep.subr.mxu1 %v1368_v34 }
0x14ff   :  { %1687 = vmatpush3.msra.mxu1 %v1352_v2 }
0x155e   :  { %v1241_v17 = vpop.permute.xlu1 %1240 }
0x155f   :  { %v1243_v20 = vmul.f32 %v2260_v35, %v1241_v17  ;;  %v1367_v35 = vld [vmem:[#allocation11 + $0x90] sm:$0xff] }
0x1560   :  { %1688 = vmatprep.subr.mxu1 %v1367_v35 }
0x1561   :  { %v1250_v23 = vsel %vm1249_vm2, %v1243_v20, %v1106_v22  ;;  %1689 = vmatpush3.msra.mxu1 %v1351_v36 }
0x1562   :  { %1272 = vrot.lane.b32.xlu0 %v1250_v23, %s2000_s22  ;;  %1690 = vmatprep.subr.mxu1 %v1366_v3 }
0x1563   :  { %1691 = vmatpush3.msra.mxu1 %v1350_v4 }
0x1564   :  { %1692 = vmatprep.subr.mxu1 %v1365_v37 }
0x1565   :  { %1693 = vmatpush3.msra.mxu1 %v1349_v38 }
0x15d4   :  { %v1273_v32 = vpop.permute.xlu0 %1272 }
0x15d5   :  { %1620 = vmatmul.mubr.msk.f32.vlgmr.msra.gmra.mxu0 %vm137_vm1, %v1273_v32 }
0x1695   :  { %v1342_v47 = vpop.f32.mrf.mxu0 }
0x1696   :  { %v1343_v48 = vadd.f32 %v1342_v47, %v1264_v44 }
0x1697   :  { %v1344_v49 = vpop.f32.mrf.mxu0 }
0x1698   :  { %v1345_v50 = vadd.f32 %v1344_v49, %v1268_v46  ;;  %v1347_v52 = vmax.f32 %v1343_v48, 0.0 }
0x169a   :  { %v1348_v51 = vmax.f32 %v1345_v50, 0.0 }
0x169c   :  { %1452 = vmatprep.mubr.f32.mxu1 %v1348_v51 }
0x169d   :  { %1453 = vmatmul.mubr.f32.vlgmr.msra.gmra.mxu1 %v1347_v52 }
0x175d   :  { %v1694_v54 = vpop.f32.mrf.mxu1 }
0x175f   :  { %v1695_v55 = vpop.f32.mrf.mxu1 }
0x1760   :  { %v1696_v57 = vadd.f32 %v1695_v55, %v1694_v54 }
0x1762   :  { %v1455_v58 = vadd.f32 %v1696_v57, %v1621_v56 }
0x1764   :  { %1458 = vst [vmem:[#allocation13] sm:$0xff] %v1455_v58 }
0x1765   :  { %1969 = shalt.err (!%p1966_p1)
}
0x1766   :  { %1468 = dma.vmem_to_hbm [thread:$0]  %s1466_s14, 128, %s2294_s8, [#allocation5]  }
0x1767   :  { %1986 = dma.done.wait [#allocation5], 128  }
0x1768   :  { %1987 = vsyncadd [#allocation5], 4294967168 }
0x1769   :  { %1472 = vsyncpa [#allocation4], 1 }
0x176a   :  { %1473 = vsyncpa [#allocation9], 1 }
0x176b   :  { %1474 = vsyncpa [#allocation12], 1 }
0x176c   :  { %1475 = vsyncpa [#allocation5], 1 }
0x176d   :  { %1476 = vsyncpa [#allocation6], 1 }

</bundles_post_ra>
